<compile_context>
chip_gen: v6e
topology: v6e:2x2x1
jax: 0.10.0
libtpu: 0.0.40
codegen_flags: <defaults>
</compile_context>

<pallas_src>
import functools
import math

import numpy as np
import jax
import jax.numpy as jnp
from jax.experimental import pallas as pl
from jax.experimental.pallas import tpu as pltpu

BN_EPS = 1e-5
LANE = 128
VMEM_LIMIT = 48 * 1024 * 1024        # fits v5e/v6e (128 MiB) and v7x (64 MiB physical)
MATMUL_DTYPE = jnp.bfloat16          # MXU operand dtype; accumulation stays f32


def _round_up(x, m):
    return (x + m - 1) // m * m


def _compiler_params():
    return pltpu.CompilerParams(
        dimension_semantics=("parallel",),
        vmem_limit_bytes=VMEM_LIMIT)


# --------------------------------------------------------------------------- #
# Kernel 1: fused 3x3 conv (convl2l + convg2l + convl2g) + conv1 (1x1+BN+ReLU) #
# --------------------------------------------------------------------------- #

def _conv3x3_fused_kernel(x_ref, w_ref, s_ref, b_ref, o_ref,
                          *, width, relu_lo, relu_hi):
    v = x_ref[...]                                                 # [TH, W+2, 3*Cin] bf16
    th = v.shape[0]
    # The three kh (row) taps are already stacked on the channel dim (done once
    # in XLA, 3x traffic); build the three kw (column) taps here in VMEM.
    cols = jnp.concatenate(
        [v[:, 0:width, :], v[:, 1:width + 1, :], v[:, 2:width + 2, :]], axis=-1)
    a = cols.reshape(th * width, cols.shape[-1])                   # [TH*W, 9*Cin]
    y = jnp.dot(a, w_ref[...], preferred_element_type=jnp.float32)
    y = y * s_ref[...] + b_ref[...]                                # folded BN (per column)
    n = y.shape[-1]
    col = jax.lax.broadcasted_iota(jnp.int32, (1, n), 1)
    relu_cols = (col >= relu_lo) & (col < relu_hi)                 # only the conv1 columns
    y = jnp.where(relu_cols, jnp.maximum(y, 0.0), y)
    o_ref[...] = y.reshape(th, width, n)


def conv3x3_fused(xsh, w, scale, bias, *, relu_lo, relu_hi, row_tile=8):
    """xsh: [B*H, W+2, 3*Cin] (kh-stacked, W-padded, bf16) -> [B*H, W, Npad] f32."""
    bh, wp2, c3 = xsh.shape
    width = wp2 - 2
    n = w.shape[1]
    th = min(row_tile, bh)
    grid = (pl.cdiv(bh, th),)
    return pl.pallas_call(
        functools.partial(_conv3x3_fused_kernel, width=width,
                          relu_lo=relu_lo, relu_hi=relu_hi),
        out_shape=jax.ShapeDtypeStruct((bh, width, n), jnp.float32),
        grid=grid,
        in_specs=[
            pl.BlockSpec((th, wp2, c3), lambda i: (i, 0, 0)),
            pl.BlockSpec(w.shape, lambda i: (0, 0)),
            pl.BlockSpec((1, n), lambda i: (0, 0)),
            pl.BlockSpec((1, n), lambda i: (0, 0)),
        ],
        out_specs=pl.BlockSpec((th, width, n), lambda i: (i, 0, 0)),
        compiler_params=_compiler_params(),
    )(xsh, w, scale.reshape(1, n), bias.reshape(1, n))


# --------------------------------------------------------------------------- #
# Kernel 2: 1x1 conv (matmul) + BN scale/bias + optional ReLU                  #
# --------------------------------------------------------------------------- #

def _mm_scale_bias_kernel(x_ref, w_ref, s_ref, b_ref, o_ref, *, relu):
    y = jnp.dot(x_ref[...], w_ref[...], preferred_element_type=jnp.float32)
    y = y * s_ref[...] + b_ref[...]
    if relu:
        y = jnp.maximum(y, 0.0)
    o_ref[...] = y


def mm_scale_bias(x, w, scale, bias, *, relu, row_tile=256):
    m, k = x.shape
    n = w.shape[1]
    tm = min(row_tile, m)
    grid = (pl.cdiv(m, tm),)
    return pl.pallas_call(
        functools.partial(_mm_scale_bias_kernel, relu=relu),
        out_shape=jax.ShapeDtypeStruct((m, n), jnp.float32),
        grid=grid,
        in_specs=[
            pl.BlockSpec((tm, k), lambda i: (i, 0)),
            pl.BlockSpec((k, n), lambda i: (0, 0)),
            pl.BlockSpec((1, n), lambda i: (0, 0)),
            pl.BlockSpec((1, n), lambda i: (0, 0)),
        ],
        out_specs=pl.BlockSpec((tm, n), lambda i: (i, 0)),
        compiler_params=_compiler_params(),
    )(x, w, scale.reshape(1, n), bias.reshape(1, n))


# --------------------------------------------------------------------------- #
# Kernel 3: conv2(x1 + fu + lfu) + convl2g(x_l)   (fused)                      #
# --------------------------------------------------------------------------- #

def _spectral_out_kernel(big_ref, fu_ref, lfu_ref, w_ref, o_ref,
                         *, x1_off, red, l2g_off, out_cg):
    big = big_ref[...]                                   # [TM, Npad] f32
    x1 = big[:, x1_off:x1_off + red]                     # conv1 output (BN+ReLU already)
    l2g = big[:, l2g_off:l2g_off + out_cg]               # convl2g(x_l)
    s = x1 + fu_ref[...] + lfu_ref[...]
    # w_ref has an identity block appended so l2g is routed straight to the output.
    a = jnp.concatenate([s, l2g], axis=-1).astype(MATMUL_DTYPE)
    o_ref[...] = jnp.dot(a, w_ref[...], preferred_element_type=jnp.float32)


def spectral_out(big_flat, fu_flat, lfu_flat, w_ext, *, x1_off, red,
                 l2g_off, out_cg, row_tile=256):
    m, npad_in = big_flat.shape
    n = w_ext.shape[1]
    tm = min(row_tile, m)
    grid = (pl.cdiv(m, tm),)
    return pl.pallas_call(
        functools.partial(_spectral_out_kernel, x1_off=x1_off, red=red,
                          l2g_off=l2g_off, out_cg=out_cg),
        out_shape=jax.ShapeDtypeStruct((m, n), jnp.float32),
        grid=grid,
        in_specs=[
            pl.BlockSpec((tm, npad_in), lambda i: (i, 0)),
            pl.BlockSpec((tm, red), lambda i: (i, 0)),
            pl.BlockSpec((tm, red), lambda i: (i, 0)),
            pl.BlockSpec(w_ext.shape, lambda i: (0, 0)),
        ],
        out_specs=pl.BlockSpec((tm, n), lambda i: (i, 0)),
        compiler_params=_compiler_params(),
    )(big_flat, fu_flat, lfu_flat, w_ext)


# --------------------------------------------------------------------------- #
# FourierUnit glue                                                             #
# --------------------------------------------------------------------------- #

def fourier_unit(x, w_blk, scale, bias):
    """FourierUnit.forward.  x: [B,H,W,C] NHWC, FFT along W (torch's last NCHW dim)."""
    b, h, w, c = x.shape
    # TODO(synk): torch.fft.rfft / irfft have no Pallas primitive; they run as XLA
    # ops around the Pallas 1x1-conv matmul kernel.
    f = jnp.fft.rfft(x, axis=2, norm="ortho")                     # [B,H,Wf,C] complex64
    wf = f.shape[2]
    ri = jnp.concatenate([jnp.real(f), jnp.imag(f)], axis=-1)     # block [re | im] layout
    flat = ri.reshape(b * h * wf, 2 * c).astype(MATMUL_DTYPE)
    y = mm_scale_bias(flat, w_blk, scale, bias, relu=True)        # [M, Npad] f32
    yr = y[:, :c].reshape(b, h, wf, c)
    yi = y[:, c:2 * c].reshape(b, h, wf, c)
    return jnp.fft.irfft(jax.lax.complex(yr, yi), n=w, axis=2, norm="ortho")


# --------------------------------------------------------------------------- #
# FFC forward                                                                  #
# --------------------------------------------------------------------------- #

def ffc_forward(x_nchw, p, cfg):
    """FFC.forward for a single (non-tuple) NCHW input; stride=1, bias=False, LFU on."""
    out_cl, out_cg, red = cfg["out_cl"], cfg["out_cg"], cfg["red"]
    x = jnp.transpose(x_nchw, (0, 2, 3, 1)).astype(jnp.float32)   # NHWC
    b, h, w, c = x.shape
    x1_off = out_cl + out_cg

    # ---- fused convl2l + convg2l + convl2g + SpectralTransform.conv1 --------
    xp = jnp.pad(x, ((0, 0), (1, 1), (1, 1), (0, 0)))
    xsh = jnp.concatenate([xp[:, 0:h], xp[:, 1:h + 1], xp[:, 2:h + 2]], axis=-1)
    xsh = xsh.reshape(b * h, w + 2, 3 * c).astype(MATMUL_DTYPE)

    big = conv3x3_fused(xsh, p["w_big"], p["big_scale"], p["big_bias"],
                        relu_lo=x1_off, relu_hi=x1_off + red)      # [B*H, W, Npad] f32
    npad = big.shape[-1]
    big4 = big.reshape(b, h, w, npad)
    x1 = big4[..., x1_off:x1_off + red]                            # ReLU(BN(conv1(x_g)))

    # ---- SpectralTransform: global FourierUnit ------------------------------
    fu = fourier_unit(x1, p["fu_w"], p["fu_scale"], p["fu_bias"])

    # ---- SpectralTransform: local FourierUnit (LFU) -------------------------
    c4 = red // 4
    sh, sw = h // 2, w // 2
    xs = x1[:, :2 * sh, :2 * sw, :c4]
    xs = jnp.concatenate([xs[:, :sh], xs[:, sh:]], axis=-1)        # split along H
    xs = jnp.concatenate([xs[:, :, :sw], xs[:, :, sw:]], axis=-1)  # split along W
    lfu = fourier_unit(xs, p["lfu_w"], p["lfu_scale"], p["lfu_bias"])
    lfu = jnp.tile(lfu, (1, 2, 2, 1))
    if h % 2 != 0:
        lfu = jnp.pad(lfu, ((0, 0), (0, 1), (0, 0), (0, 0)), mode="edge")
    if w % 2 != 0:
        lfu = jnp.pad(lfu, ((0, 0), (0, 0), (0, 1), (0, 0)), mode="edge")

    # ---- conv2(x1 + fu + lfu) + convl2g(x_l)  (fused Pallas kernel) ---------
    m = b * h * w
    xg_full = spectral_out(big.reshape(m, npad), fu.reshape(m, red),
                           lfu.reshape(m, red), p["w2_ext"],
                           x1_off=x1_off, red=red, l2g_off=out_cl, out_cg=out_cg)

    out_xl = jnp.transpose(big4[..., :out_cl], (0, 3, 1, 2))                       # NCHW
    out_xg = jnp.transpose(xg_full[:, :out_cg].reshape(b, h, w, out_cg), (0, 3, 1, 2))
    return out_xl, out_xg


# --------------------------------------------------------------------------- #
# Parameter construction (matches the PyTorch module's layouts)                #
# --------------------------------------------------------------------------- #

def _fu_weight_block(w_torch, npad):
    """Torch [2C,2C,1,1] 1x1 conv (interleaved c0_re,c0_im,...) -> block-layout matmul weight."""
    m = np.asarray(w_torch)[:, :, 0, 0]                  # [out=2C, in=2C]
    c = m.shape[0] // 2
    perm = np.concatenate([np.arange(c) * 2, np.arange(c) * 2 + 1])
    m = m[perm][:, perm]                                 # rows/cols -> [re block | im block]
    out = np.zeros((m.shape[0], npad), np.float32)
    out[:, :m.shape[0]] = m.T                            # [in, out], lane-padded
    return jnp.asarray(out, MATMUL_DTYPE)


def init_params(key, in_channels=8, out_channels=8, ratio_gin=0.5, ratio_gout=0.5):
    in_cg = int(in_channels * ratio_gin)
    in_cl = in_channels - in_cg
    out_cg = int(out_channels * ratio_gout)
    out_cl = out_channels - out_cg
    red = out_cg // 2
    if red % 4 != 0:                                     # matches SpectralTransform.__init__
        red += 4 - red % 4

    c = in_channels
    x1_off = out_cl + out_cg
    npad = max(LANE, _round_up(x1_off + red, LANE))
    npad_fu = max(LANE, _round_up(2 * red, LANE))
    npad_g = max(LANE, _round_up(out_cg, LANE))

    ks = jax.random.split(key, 7)

    def rnd(k, shape, s=0.1):
        return np.asarray(jax.random.normal(k, shape, jnp.float32)) * s

    w_l2l = rnd(ks[0], (out_cl, in_cl, 3, 3))
    w_l2g = rnd(ks[1], (out_cg, in_cl, 3, 3))
    w_g2l = rnd(ks[2], (out_cl, in_cg, 3, 3))
    st_w1 = rnd(ks[3], (red, in_cg, 1, 1))
    fu_w = rnd(ks[4], (2 * red, 2 * red, 1, 1))
    lfu_w = rnd(ks[5], (2 * red, 2 * red, 1, 1))
    st_w2 = rnd(ks[6], (out_cg, red, 1, 1))

    # BatchNorm folded (inference mode, default running stats: mean=0, var=1, g=1, b=0).
    bn_scale_val = np.float32(1.0 / math.sqrt(1.0 + BN_EPS))

    # Big fused weight: K ordered (kw, kh, cin) to match the in-kernel unfold;
    # columns: [out_xl | l2g | conv1(BN+ReLU) | zero padding].
    wb = np.zeros((3, 3, c, npad), np.float32)           # [kw, kh, cin, n]
    wb[:, :, :in_cl, :out_cl] = np.transpose(w_l2l, (3, 2, 1, 0))
    wb[:, :, in_cl:, :out_cl] = np.transpose(w_g2l, (3, 2, 1, 0))
    wb[:, :, :in_cl, out_cl:out_cl + out_cg] = np.transpose(w_l2g, (3, 2, 1, 0))
    wb[1, 1, in_cl:, x1_off:x1_off + red] = st_w1[:, :, 0, 0].T   # 1x1 conv = center tap
    big_scale = np.ones((npad,), np.float32)
    big_bias = np.zeros((npad,), np.float32)
    big_scale[x1_off:x1_off + red] = bn_scale_val

    fu_scale = np.ones((npad_fu,), np.float32)
    fu_scale[:2 * red] = bn_scale_val
    fu_bias = np.zeros((npad_fu,), np.float32)

    # conv2 weight with an identity block appended: [x1+fu+lfu | l2g] @ w2_ext.
    w2e = np.zeros((red + out_cg, npad_g), np.float32)
    w2e[:red, :out_cg] = st_w2[:, :, 0, 0].T
    w2e[red:, :out_cg] = np.eye(out_cg, dtype=np.float32)

    params = dict(
        w_big=jnp.asarray(wb.reshape(9 * c, npad), MATMUL_DTYPE),
        big_scale=jnp.asarray(big_scale),
        big_bias=jnp.asarray(big_bias),
        fu_w=_fu_weight_block(fu_w, npad_fu),
        fu_scale=jnp.asarray(fu_scale), fu_bias=jnp.asarray(fu_bias),
        lfu_w=_fu_weight_block(lfu_w, npad_fu),
        lfu_scale=jnp.asarray(fu_scale), lfu_bias=jnp.asarray(fu_bias),
        w2_ext=jnp.asarray(w2e, MATMUL_DTYPE),
    )
    cfg = dict(out_cl=out_cl, out_cg=out_cg, red=red)
    return params, cfg


if __name__ == "__main__":
    key = jax.random.PRNGKey(0)
    kx, kp = jax.random.split(key)

    # FFC(in_channels=8, out_channels=8, ratio_gin=0.5, ratio_gout=0.5)
    x = jax.random.normal(kx, (2, 8, 16, 16), jnp.float32)   # NCHW like PyTorch
    params, cfg = init_params(kp, in_channels=8, out_channels=8,
                              ratio_gin=0.5, ratio_gout=0.5)

    fwd = jax.jit(functools.partial(ffc_forward, cfg=cfg))
    out_xl, out_xg = fwd(x, params)
    jax.block_until_ready((out_xl, out_xg))

    assert out_xl.shape == (2, 4, 16, 16), out_xl.shape
    assert out_xg.shape == (2, 4, 16, 16), out_xg.shape
    assert out_xl.dtype == jnp.float32 and out_xg.dtype == jnp.float32
    assert bool(jnp.all(jnp.isfinite(out_xl))) and bool(jnp.all(jnp.isfinite(out_xg)))
    print("KERNEL_OK")
</pallas_src>

<mosaic_0001>
module attributes {stable_mosaic.version = 11 : i64} {
  func.func @_conv3x3_fused_kernel(%arg0: i32, %arg1: memref<8x18x24xbf16, #tpu.memory_space<vmem>>, %arg2: memref<72x128xbf16, #tpu.memory_space<vmem>>, %arg3: memref<1x128xf32, #tpu.memory_space<vmem>>, %arg4: memref<1x128xf32, #tpu.memory_space<vmem>>, %arg5: memref<8x16x128xf32, #tpu.memory_space<vmem>>) attributes {dimension_semantics = [#tpu.dimension_semantics<parallel>], iteration_bounds = array<i64: 4>, scalar_prefetch = 0 : i64, scratch_operands = 0 : i64, tpu.core_type = #tpu.core_type<tc>, window_params = [{transform_indices = @transform_0, window_bounds = array<i64: 8, 18, 24>}, {pipeline_mode = #tpu.pipeline_mode<synchronous>, transform_indices = @transform_1, window_bounds = array<i64: 72, 128>}, {pipeline_mode = #tpu.pipeline_mode<synchronous>, transform_indices = @transform_2, window_bounds = array<i64: 1, 128>}, {pipeline_mode = #tpu.pipeline_mode<synchronous>, transform_indices = @transform_3, window_bounds = array<i64: 1, 128>}, {transform_indices = @transform_4, window_bounds = array<i64: 8, 16, 128>}]} {
    %c0 = arith.constant 0 : index
    %c0_0 = arith.constant 0 : index
    %c0_1 = arith.constant 0 : index
    %0 = vector.load %arg1[%c0, %c0_0, %c0_1] : memref<8x18x24xbf16, #tpu.memory_space<vmem>>, vector<8x18x24xbf16>
    %1 = vector.extract_strided_slice %0 {offsets = [0, 0, 0], sizes = [8, 16, 24], strides = [1, 1, 1]} : vector<8x18x24xbf16> to vector<8x16x24xbf16>
    %2 = vector.extract_strided_slice %0 {offsets = [0, 1, 0], sizes = [8, 16, 24], strides = [1, 1, 1]} : vector<8x18x24xbf16> to vector<8x16x24xbf16>
    %3 = vector.extract_strided_slice %0 {offsets = [0, 2, 0], sizes = [8, 16, 24], strides = [1, 1, 1]} : vector<8x18x24xbf16> to vector<8x16x24xbf16>
    %4 = tpu.concatenate %1, %2, %3 in 2 : vector<8x16x24xbf16>, vector<8x16x24xbf16>, vector<8x16x24xbf16> -> vector<8x16x72xbf16>
    %5 = vector.shape_cast %4 : vector<8x16x72xbf16> to vector<128x72xbf16>
    %c0_2 = arith.constant 0 : index
    %c0_3 = arith.constant 0 : index
    %6 = vector.load %arg2[%c0_2, %c0_3] : memref<72x128xbf16, #tpu.memory_space<vmem>>, vector<72x128xbf16>
    %cst = arith.constant dense<0.000000e+00> : vector<128x128xf32>
    %7 = tpu.matmul %5, %6, %cst {dimension_numbers = #tpu.dot_dimension_numbers<[1], [0], [0], [1], [0, 0, 1, 1], [], []>} : vector<128x72xbf16>, vector<72x128xbf16>, vector<128x128xf32> -> vector<128x128xf32>
    %c0_4 = arith.constant 0 : index
    %c0_5 = arith.constant 0 : index
    %8 = vector.load %arg3[%c0_4, %c0_5] : memref<1x128xf32, #tpu.memory_space<vmem>>, vector<1x128xf32>
    %9 = vector.broadcast %8 : vector<1x128xf32> to vector<128x128xf32>
    %10 = arith.mulf %7, %9 : vector<128x128xf32>
    %c0_6 = arith.constant 0 : index
    %c0_7 = arith.constant 0 : index
    %11 = vector.load %arg4[%c0_6, %c0_7] : memref<1x128xf32, #tpu.memory_space<vmem>>, vector<1x128xf32>
    %12 = vector.broadcast %11 : vector<1x128xf32> to vector<128x128xf32>
    %13 = arith.addf %10, %12 : vector<128x128xf32>
    %14 = tpu.iota {dimensions = array<i32: 1>} : vector<1x128xi32>
    %c8_i32 = arith.constant 8 : i32
    %15 = vector.broadcast %c8_i32 : i32 to vector<1x128xi32>
    %16 = arith.cmpi sge, %14, %15 : vector<1x128xi32>
    %c12_i32 = arith.constant 12 : i32
    %17 = vector.broadcast %c12_i32 : i32 to vector<1x128xi32>
    %18 = arith.cmpi slt, %14, %17 : vector<1x128xi32>
    %19 = arith.andi %16, %18 : vector<1x128xi1>
    %cst_8 = arith.constant 0.000000e+00 : f32
    %20 = vector.broadcast %cst_8 : f32 to vector<128x128xf32>
    %21 = arith.maximumf %13, %20 : vector<128x128xf32>
    %22 = vector.shape_cast %19 : vector<1x128xi1> to vector<1x128xi1>
    %23 = vector.broadcast %22 : vector<1x128xi1> to vector<128x128xi1>
    %24 = arith.select %23, %21, %13 : vector<128x128xi1>, vector<128x128xf32>
    %25 = vector.shape_cast %24 : vector<128x128xf32> to vector<8x16x128xf32>
    %c0_9 = arith.constant 0 : index
    %c0_10 = arith.constant 0 : index
    %c0_11 = arith.constant 0 : index
    %26 = vector.load %arg5[%c0_9, %c0_10, %c0_11] : memref<8x16x128xf32, #tpu.memory_space<vmem>>, vector<8x16x128xf32>
    tpu.vector_store %arg5[%c0_9, %c0_10, %c0_11], %25 {strides = array<i32>} : memref<8x16x128xf32, #tpu.memory_space<vmem>>, vector<8x16x128xf32>,
    return
  }
  func.func @transform_0(%arg0: i32) -> (i32, i32, i32) {
    %c0_i32 = arith.constant 0 : i32
    %c0_i32_0 = arith.constant 0 : i32
    %c0_i32_1 = arith.constant 0 : i32
    return %arg0, %c0_i32, %c0_i32_0 : i32, i32, i32
  }
  func.func @transform_1(%arg0: i32) -> (i32, i32) {
    %c0_i32 = arith.constant 0 : i32
    %c0_i32_0 = arith.constant 0 : i32
    %c0_i32_1 = arith.constant 0 : i32
    return %c0_i32, %c0_i32_0 : i32, i32
  }
  func.func @transform_2(%arg0: i32) -> (i32, i32) {
    %c0_i32 = arith.constant 0 : i32
    %c0_i32_0 = arith.constant 0 : i32
    %c0_i32_1 = arith.constant 0 : i32
    return %c0_i32, %c0_i32_0 : i32, i32
  }
  func.func @transform_3(%arg0: i32) -> (i32, i32) {
    %c0_i32 = arith.constant 0 : i32
    %c0_i32_0 = arith.constant 0 : i32
    %c0_i32_1 = arith.constant 0 : i32
    return %c0_i32, %c0_i32_0 : i32, i32
  }
  func.func @transform_4(%arg0: i32) -> (i32, i32, i32) {
    %c0_i32 = arith.constant 0 : i32
    %c0_i32_0 = arith.constant 0 : i32
    %c0_i32_1 = arith.constant 0 : i32
    return %arg0, %c0_i32, %c0_i32_0 : i32, i32, i32
  }
}

module attributes {stable_mosaic.version = 11 : i64} {
  func.func @_mm_scale_bias_kernel(%arg0: i32, %arg1: memref<256x8xbf16, #tpu.memory_space<vmem>>, %arg2: memref<8x128xbf16, #tpu.memory_space<vmem>>, %arg3: memref<1x128xf32, #tpu.memory_space<vmem>>, %arg4: memref<1x128xf32, #tpu.memory_space<vmem>>, %arg5: memref<256x128xf32, #tpu.memory_space<vmem>>) attributes {dimension_semantics = [#tpu.dimension_semantics<parallel>], iteration_bounds = array<i64: 2>, scalar_prefetch = 0 : i64, scratch_operands = 0 : i64, tpu.core_type = #tpu.core_type<tc>, window_params = [{transform_indices = @transform_0, window_bounds = array<i64: 256, 8>}, {pipeline_mode = #tpu.pipeline_mode<synchronous>, transform_indices = @transform_1, window_bounds = array<i64: 8, 128>}, {pipeline_mode = #tpu.pipeline_mode<synchronous>, transform_indices = @transform_2, window_bounds = array<i64: 1, 128>}, {pipeline_mode = #tpu.pipeline_mode<synchronous>, transform_indices = @transform_3, window_bounds = array<i64: 1, 128>}, {transform_indices = @transform_4, window_bounds = array<i64: 256, 128>}]} {
    %c0 = arith.constant 0 : index
    %c0_0 = arith.constant 0 : index
    %0 = vector.load %arg1[%c0, %c0_0] : memref<256x8xbf16, #tpu.memory_space<vmem>>, vector<256x8xbf16>
    %c0_1 = arith.constant 0 : index
    %c0_2 = arith.constant 0 : index
    %1 = vector.load %arg2[%c0_1, %c0_2] : memref<8x128xbf16, #tpu.memory_space<vmem>>, vector<8x128xbf16>
    %cst = arith.constant dense<0.000000e+00> : vector<256x128xf32>
    %2 = tpu.matmul %0, %1, %cst {dimension_numbers = #tpu.dot_dimension_numbers<[1], [0], [0], [1], [0, 0, 1, 1], [], []>} : vector<256x8xbf16>, vector<8x128xbf16>, vector<256x128xf32> -> vector<256x128xf32>
    %c0_3 = arith.constant 0 : index
    %c0_4 = arith.constant 0 : index
    %3 = vector.load %arg3[%c0_3, %c0_4] : memref<1x128xf32, #tpu.memory_space<vmem>>, vector<1x128xf32>
    %4 = vector.broadcast %3 : vector<1x128xf32> to vector<256x128xf32>
    %5 = arith.mulf %2, %4 : vector<256x128xf32>
    %c0_5 = arith.constant 0 : index
    %c0_6 = arith.constant 0 : index
    %6 = vector.load %arg4[%c0_5, %c0_6] : memref<1x128xf32, #tpu.memory_space<vmem>>, vector<1x128xf32>
    %7 = vector.broadcast %6 : vector<1x128xf32> to vector<256x128xf32>
    %8 = arith.addf %5, %7 : vector<256x128xf32>
    %cst_7 = arith.constant 0.000000e+00 : f32
    %9 = vector.broadcast %cst_7 : f32 to vector<256x128xf32>
    %10 = arith.maximumf %8, %9 : vector<256x128xf32>
    %c0_8 = arith.constant 0 : index
    %c0_9 = arith.constant 0 : index
    %11 = vector.load %arg5[%c0_8, %c0_9] : memref<256x128xf32, #tpu.memory_space<vmem>>, vector<256x128xf32>
    tpu.vector_store %arg5[%c0_8, %c0_9], %10 {strides = array<i32>} : memref<256x128xf32, #tpu.memory_space<vmem>>, vector<256x128xf32>,
    return
  }
  func.func @transform_0(%arg0: i32) -> (i32, i32) {
    %c0_i32 = arith.constant 0 : i32
    %c0_i32_0 = arith.constant 0 : i32
    return %arg0, %c0_i32 : i32, i32
  }
  func.func @transform_1(%arg0: i32) -> (i32, i32) {
    %c0_i32 = arith.constant 0 : i32
    %c0_i32_0 = arith.constant 0 : i32
    %c0_i32_1 = arith.constant 0 : i32
    return %c0_i32, %c0_i32_0 : i32, i32
  }
  func.func @transform_2(%arg0: i32) -> (i32, i32) {
    %c0_i32 = arith.constant 0 : i32
    %c0_i32_0 = arith.constant 0 : i32
    %c0_i32_1 = arith.constant 0 : i32
    return %c0_i32, %c0_i32_0 : i32, i32
  }
  func.func @transform_3(%arg0: i32) -> (i32, i32) {
    %c0_i32 = arith.constant 0 : i32
    %c0_i32_0 = arith.constant 0 : i32
    %c0_i32_1 = arith.constant 0 : i32
    return %c0_i32, %c0_i32_0 : i32, i32
  }
  func.func @transform_4(%arg0: i32) -> (i32, i32) {
    %c0_i32 = arith.constant 0 : i32
    %c0_i32_0 = arith.constant 0 : i32
    return %arg0, %c0_i32 : i32, i32
  }
}

module attributes {stable_mosaic.version = 11 : i64} {
  func.func @_mm_scale_bias_kernel(%arg0: i32, %arg1: memref<80x8xbf16, #tpu.memory_space<vmem>>, %arg2: memref<8x128xbf16, #tpu.memory_space<vmem>>, %arg3: memref<1x128xf32, #tpu.memory_space<vmem>>, %arg4: memref<1x128xf32, #tpu.memory_space<vmem>>, %arg5: memref<80x128xf32, #tpu.memory_space<vmem>>) attributes {dimension_semantics = [#tpu.dimension_semantics<parallel>], iteration_bounds = array<i64: 1>, scalar_prefetch = 0 : i64, scratch_operands = 0 : i64, tpu.core_type = #tpu.core_type<tc>, window_params = [{transform_indices = @transform_0, window_bounds = array<i64: 80, 8>}, {pipeline_mode = #tpu.pipeline_mode<synchronous>, transform_indices = @transform_1, window_bounds = array<i64: 8, 128>}, {pipeline_mode = #tpu.pipeline_mode<synchronous>, transform_indices = @transform_2, window_bounds = array<i64: 1, 128>}, {pipeline_mode = #tpu.pipeline_mode<synchronous>, transform_indices = @transform_3, window_bounds = array<i64: 1, 128>}, {transform_indices = @transform_4, window_bounds = array<i64: 80, 128>}]} {
    %c0 = arith.constant 0 : index
    %c0_0 = arith.constant 0 : index
    %0 = vector.load %arg1[%c0, %c0_0] : memref<80x8xbf16, #tpu.memory_space<vmem>>, vector<80x8xbf16>
    %c0_1 = arith.constant 0 : index
    %c0_2 = arith.constant 0 : index
    %1 = vector.load %arg2[%c0_1, %c0_2] : memref<8x128xbf16, #tpu.memory_space<vmem>>, vector<8x128xbf16>
    %cst = arith.constant dense<0.000000e+00> : vector<80x128xf32>
    %2 = tpu.matmul %0, %1, %cst {dimension_numbers = #tpu.dot_dimension_numbers<[1], [0], [0], [1], [0, 0, 1, 1], [], []>} : vector<80x8xbf16>, vector<8x128xbf16>, vector<80x128xf32> -> vector<80x128xf32>
    %c0_3 = arith.constant 0 : index
    %c0_4 = arith.constant 0 : index
    %3 = vector.load %arg3[%c0_3, %c0_4] : memref<1x128xf32, #tpu.memory_space<vmem>>, vector<1x128xf32>
    %4 = vector.broadcast %3 : vector<1x128xf32> to vector<80x128xf32>
    %5 = arith.mulf %2, %4 : vector<80x128xf32>
    %c0_5 = arith.constant 0 : index
    %c0_6 = arith.constant 0 : index
    %6 = vector.load %arg4[%c0_5, %c0_6] : memref<1x128xf32, #tpu.memory_space<vmem>>, vector<1x128xf32>
    %7 = vector.broadcast %6 : vector<1x128xf32> to vector<80x128xf32>
    %8 = arith.addf %5, %7 : vector<80x128xf32>
    %cst_7 = arith.constant 0.000000e+00 : f32
    %9 = vector.broadcast %cst_7 : f32 to vector<80x128xf32>
    %10 = arith.maximumf %8, %9 : vector<80x128xf32>
    %c0_8 = arith.constant 0 : index
    %c0_9 = arith.constant 0 : index
    %11 = vector.load %arg5[%c0_8, %c0_9] : memref<80x128xf32, #tpu.memory_space<vmem>>, vector<80x128xf32>
    tpu.vector_store %arg5[%c0_8, %c0_9], %10 {strides = array<i32>} : memref<80x128xf32, #tpu.memory_space<vmem>>, vector<80x128xf32>,
    return
  }
  func.func @transform_0(%arg0: i32) -> (i32, i32) {
    %c0_i32 = arith.constant 0 : i32
    %c0_i32_0 = arith.constant 0 : i32
    return %arg0, %c0_i32 : i32, i32
  }
  func.func @transform_1(%arg0: i32) -> (i32, i32) {
    %c0_i32 = arith.constant 0 : i32
    %c0_i32_0 = arith.constant 0 : i32
    %c0_i32_1 = arith.constant 0 : i32
    return %c0_i32, %c0_i32_0 : i32, i32
  }
  func.func @transform_2(%arg0: i32) -> (i32, i32) {
    %c0_i32 = arith.constant 0 : i32
    %c0_i32_0 = arith.constant 0 : i32
    %c0_i32_1 = arith.constant 0 : i32
    return %c0_i32, %c0_i32_0 : i32, i32
  }
  func.func @transform_3(%arg0: i32) -> (i32, i32) {
    %c0_i32 = arith.constant 0 : i32
    %c0_i32_0 = arith.constant 0 : i32
    %c0_i32_1 = arith.constant 0 : i32
    return %c0_i32, %c0_i32_0 : i32, i32
  }
  func.func @transform_4(%arg0: i32) -> (i32, i32) {
    %c0_i32 = arith.constant 0 : i32
    %c0_i32_0 = arith.constant 0 : i32
    return %arg0, %c0_i32 : i32, i32
  }
}

module attributes {stable_mosaic.version = 11 : i64} {
  func.func @_spectral_out_kernel(%arg0: i32, %arg1: memref<256x128xf32, #tpu.memory_space<vmem>>, %arg2: memref<256x4xf32, #tpu.memory_space<vmem>>, %arg3: memref<256x4xf32, #tpu.memory_space<vmem>>, %arg4: memref<8x128xbf16, #tpu.memory_space<vmem>>, %arg5: memref<256x128xf32, #tpu.memory_space<vmem>>) attributes {dimension_semantics = [#tpu.dimension_semantics<parallel>], iteration_bounds = array<i64: 2>, scalar_prefetch = 0 : i64, scratch_operands = 0 : i64, tpu.core_type = #tpu.core_type<tc>, window_params = [{transform_indices = @transform_0, window_bounds = array<i64: 256, 128>}, {transform_indices = @transform_1, window_bounds = array<i64: 256, 4>}, {transform_indices = @transform_2, window_bounds = array<i64: 256, 4>}, {pipeline_mode = #tpu.pipeline_mode<synchronous>, transform_indices = @transform_3, window_bounds = array<i64: 8, 128>}, {transform_indices = @transform_4, window_bounds = array<i64: 256, 128>}]} {
    %c0 = arith.constant 0 : index
    %c0_0 = arith.constant 0 : index
    %0 = vector.load %arg1[%c0, %c0_0] : memref<256x128xf32, #tpu.memory_space<vmem>>, vector<256x128xf32>
    %1 = vector.extract_strided_slice %0 {offsets = [0, 8], sizes = [256, 4], strides = [1, 1]} : vector<256x128xf32> to vector<256x4xf32>
    %2 = vector.extract_strided_slice %0 {offsets = [0, 4], sizes = [256, 4], strides = [1, 1]} : vector<256x128xf32> to vector<256x4xf32>
    %c0_1 = arith.constant 0 : index
    %c0_2 = arith.constant 0 : index
    %3 = vector.load %arg2[%c0_1, %c0_2] : memref<256x4xf32, #tpu.memory_space<vmem>>, vector<256x4xf32>
    %4 = arith.addf %1, %3 : vector<256x4xf32>
    %c0_3 = arith.constant 0 : index
    %c0_4 = arith.constant 0 : index
    %5 = vector.load %arg3[%c0_3, %c0_4] : memref<256x4xf32, #tpu.memory_space<vmem>>, vector<256x4xf32>
    %6 = arith.addf %4, %5 : vector<256x4xf32>
    %7 = tpu.concatenate %6, %2 in 1 : vector<256x4xf32>, vector<256x4xf32> -> vector<256x8xf32>
    %8 = arith.truncf %7 : vector<256x8xf32> to vector<256x8xbf16>
    %c0_5 = arith.constant 0 : index
    %c0_6 = arith.constant 0 : index
    %9 = vector.load %arg4[%c0_5, %c0_6] : memref<8x128xbf16, #tpu.memory_space<vmem>>, vector<8x128xbf16>
    %cst = arith.constant dense<0.000000e+00> : vector<256x128xf32>
    %10 = tpu.matmul %8, %9, %cst {dimension_numbers = #tpu.dot_dimension_numbers<[1], [0], [0], [1], [0, 0, 1, 1], [], []>} : vector<256x8xbf16>, vector<8x128xbf16>, vector<256x128xf32> -> vector<256x128xf32>
    %c0_7 = arith.constant 0 : index
    %c0_8 = arith.constant 0 : index
    %11 = vector.load %arg5[%c0_7, %c0_8] : memref<256x128xf32, #tpu.memory_space<vmem>>, vector<256x128xf32>
    tpu.vector_store %arg5[%c0_7, %c0_8], %10 {strides = array<i32>} : memref<256x128xf32, #tpu.memory_space<vmem>>, vector<256x128xf32>,
    return
  }
  func.func @transform_0(%arg0: i32) -> (i32, i32) {
    %c0_i32 = arith.constant 0 : i32
    %c0_i32_0 = arith.constant 0 : i32
    return %arg0, %c0_i32 : i32, i32
  }
  func.func @transform_1(%arg0: i32) -> (i32, i32) {
    %c0_i32 = arith.constant 0 : i32
    %c0_i32_0 = arith.constant 0 : i32
    return %arg0, %c0_i32 : i32, i32
  }
  func.func @transform_2(%arg0: i32) -> (i32, i32) {
    %c0_i32 = arith.constant 0 : i32
    %c0_i32_0 = arith.constant 0 : i32
    return %arg0, %c0_i32 : i32, i32
  }
  func.func @transform_3(%arg0: i32) -> (i32, i32) {
    %c0_i32 = arith.constant 0 : i32
    %c0_i32_0 = arith.constant 0 : i32
    %c0_i32_1 = arith.constant 0 : i32
    return %c0_i32, %c0_i32_0 : i32, i32
  }
  func.func @transform_4(%arg0: i32) -> (i32, i32) {
    %c0_i32 = arith.constant 0 : i32
    %c0_i32_0 = arith.constant 0 : i32
    return %arg0, %c0_i32 : i32, i32
  }
}

</mosaic_0001>

<bundles_post_ra>
// kernel: ffc_forward.4
= control target key start
LH: loop header
LB: loop body
LE: loop exit
PB: predicated region body
PF: predicated region fallthrough
CT: control target
= control target key end

     0   :  { %s958_s15 = smov 0   ;;  %s1220_s0 = inlined_call_operand.vmem [shape: bf16[32,18,24], index: 0, kind: input, shape index: {}]   ;;  %s1221_s1 = inlined_call_operand.vmem [shape: bf16[72,128], index: 1, kind: input, shape index: {}]   ;;  %s1222_s2 = inlined_call_operand.vmem [shape: f32[1,128], index: 2, kind: input, shape index: {}]   ;;  %s1223_s3 = inlined_call_operand.vmem [shape: f32[1,128], index: 3, kind: input, shape index: {}]   ;;  %s1224_s4 = inlined_call_operand.vmem [shape: f32[32,16,128], index: 4, kind: output, shape index: {}]  }
   0x1 LB: > { %s796_s16 = sadd.s32 4294967295, %s929_s15   ;;  %p800_p0 = scmp.ge.s32.totalorder %s929_s15, 1  ;;  %s929_s15 = sphi %s958_s15, %s14_s15  }
   0x2   : > { %p164_p1 = scmp.lt.s32.totalorder %s929_s15, 5 }
   0x4   : > { %p165_p2 = pnand %p800_p0, %p164_p1 }
   0x5   : > { %s801_s17 = sshll.u32 (!%p165_p2), %s796_s16, 3  ;;  %s931_s6 = smov (!%p165_p2), 48  }
   0x6   : > { %168 = sbr.rel (%p165_p2) target bundleno = 371 (0x173), region = 36  ;;  %p193_p3 = scmp.lt.s32.totalorder (!%p165_p2), %s801_s17, 31 }
   0x7   : > { %s932_s7 = smov (!%p165_p2), 24  }
   0xb   : > { %vm536_vm0 = vcmask 1043456   ;;  %v918_v0 = vld [vmem:[%s1221_s1 + $0x20] ss:$0 sps:$4 sm:$0xff]   ;;  %v919_v1 = vld [vmem:[%s1221_s1 + $0x18] sm:$0xff]   ;;  %s1228_s17 = smov (!%p193_p3, %s801_s17), 31  ;;  %v920_v3 = vld [vmem:[%s1221_s1 + $0x10] sm:$0xff]  }
   0xc   : > { %889 = vmatprep.subr.msk.bf16.mxu0 %vm536_vm0, %v918_v0  ;;  %v538_v2 = vsel %vm536_vm0, %v918_v0, 0  ;;  %890 = vmatprep.subr.msk.bf16.mxu1 %vm536_vm0, %v918_v0  ;;  %s891_s22 = smul.u32 12, %s1228_s17  ;;  %vm408_vm1 = vcmask 1046528   ;;  %v921_v4 = vld [vmem:[%s1221_s1 + $0x8] sm:$0xff]   ;;  %vm295_vm2 = vsmask.f32 7424 }
   0xd   : > { %854 = vmatpush3.bf16.msra.mxu0 %v538_v2  ;;  %884 = vmatpush3.bf16.msra.mxu1 %v538_v2  ;;  %v922_v12 = vld [vmem:[%s1221_s1] sm:$0xff]   ;;  %vm449_vm3 = vcmask 195584   ;;  %vm466_vm4 = vcmask 392192   ;;  %vm519_vm5 = vcmask 588800   ;;  %s839_s12 = sshll.u32 %s1228_s17, 4 }
   0xe   : > { %855 = vmatprep.subr.bf16.mxu0 %v919_v1  ;;  %880 = vmatprep.subr.bf16.mxu1 %v919_v1  ;;  %s981_s27 = scalar_lea.vmem %s1220_s0, %s891_s22  ;;  %s1138_s16 = scalar_lea.vmem %s1224_s4, %s839_s12 }
   0xf   : > { %v987_v5 = vld [vmem:[%s981_s27 + $0x30] sm:$0xff]   ;;  %v990_v6 = vld [vmem:[%s981_s27 + $0x38] ss:$0 sps:$4 sm:$0x11]   ;;  %v993_v7 = vld [vmem:[%s981_s27] sm:$0xff]  }
  0x10   : > { %v421_v8 = vrot.slane %v987_v5, 1  ;;  %v422_v9 = vrot.slane %v990_v6, 1  ;;  %v905_v10 = vld [vmem:[%s981_s27 + $0x8] ss:$0 sps:$4 sm:$0x11]   ;;  %v999_v11 = vld [vmem:[%s981_s27 + $0x3c] sm:$0xff]  }
  0x11   : > { %856 = vmatpush3.bf16.msra.mxu0 %v919_v1  ;;  %885 = vmatpush3.bf16.msra.mxu1 %v919_v1  ;;  %v409_v13 = vrot.slane %v993_v7, 1  ;;  %v1006_v14 = vld [vmem:[%s981_s27 + $0xc] sm:$0xff]   ;;  %v410_v16 = vrot.slane %v905_v10, 1  ;;  %v907_v17 = vld [vmem:[%s981_s27 + $0x44] ss:$0 sps:$4 sm:$0x11]  }
  0x12   : > { %857 = vmatprep.subr.bf16.mxu0 %v920_v3  ;;  %881 = vmatprep.subr.bf16.mxu1 %v920_v3  ;;  %v423_v15 = vsel %vm408_vm1, %v421_v8, %v422_v9  ;;  %v424_v18 = vrot.slane %v999_v11, 1  ;;  %v412_v19 = vrot.slane %v1006_v14, 1  ;;  %v425_v21 = vrot.slane %v907_v17, 1  ;;  %v909_v22 = vld [vmem:[%s981_s27 + $0x14] ss:$0 sps:$4 sm:$0x11]  }
  0x13   : > { %441 = vrot.lane.b32.xlu1 %v423_v15, %s931_s6  ;;  %v411_v20 = vsel %vm408_vm1, %v409_v13, %v410_v16  ;;  %v309_v23 = vshrl.u32 %v1006_v14, 16  ;;  %v311_v24 = vshll.u32 %v1006_v14, 16  ;;  %v297_v25 = vshrl.u32 %v993_v7, 16  ;;  %v1022_v31 = vld [vmem:[%s981_s27 + $0x48] sm:$0xff]   ;;  %v1040_v53 = vld [vmem:[%s981_s27 + $0x18] sm:$0xff]  }
  0x14   : > { %433 = vrot.lane.b32.xlu0 %v411_v20, %s931_s6  ;;  %v299_v26 = vshll.u32 %v993_v7, 16  ;;  %v426_v27 = vsel %vm408_vm1, %v424_v18, %v425_v21  ;;  %v413_v28 = vrot.slane %v909_v22, 1  ;;  %v316_v29 = vshll.u32 %v909_v22, 16  ;;  %v1029_v40 = vld [vmem:[%s981_s27 + $0x50] ss:$0 sps:$4 sm:$0x11]  }
  0x15   : > { %858 = vmatpush3.bf16.msra.mxu0 %v920_v3  ;;  %886 = vmatpush3.bf16.msra.mxu1 %v920_v3  ;;  %v304_v30 = vshll.u32 %v905_v10, 16  ;;  %v313_v32 = vrot.slane %v311_v24, 1  ;;  %v357_v34 = vshrl.u32 %v999_v11, 16  ;;  %v359_v35 = vshll.u32 %v999_v11, 16  ;;  %v1044_v55 = vld [vmem:[%s981_s27 + $0x54] sm:$0xff]   ;;  %v1049_v59 = vld [vmem:[%s981_s27 + $0x24] sm:$0xff]  }
  0x16   : > { %859 = vmatprep.subr.bf16.mxu0 %v921_v4  ;;  %882 = vmatprep.subr.bf16.mxu1 %v921_v4  ;;  %v301_v33 = vrot.slane %v299_v26, 1  ;;  %v414_v36 = vsel %vm408_vm1, %v412_v19, %v413_v28  ;;  %v318_v37 = vrot.slane %v316_v29, 1  ;;  %v364_v39 = vshll.u32 %v907_v17, 16  ;;  %v913_v54 = vld [vmem:[%s981_s27 + $0x20] ss:$0 sps:$4 sm:$0x11]  }
  0x17   : > { %443 = vrot.lane.b32.xlu1 %v426_v27, %s931_s6  ;;  %v306_v38 = vrot.slane %v304_v30, 1  ;;  %v314_v41 = vor.u32 %v313_v32, %v309_v23  ;;  %v361_v43 = vrot.slane %v359_v35, 1  ;;  %v345_v44 = vshrl.u32 %v987_v5, 16  ;;  %v915_v8 = vld [vmem:[%s981_s27 + $0x5c] ss:$0 sps:$4 sm:$0x11]  }
  0x18   : > { %435 = vrot.lane.b32.xlu0 %v414_v36, %s931_s6  ;;  %v302_v42 = vor.u32 %v301_v33, %v297_v25  ;;  %v366_v45 = vrot.slane %v364_v39, 1  ;;  %v347_v46 = vshll.u32 %v987_v5, 16  ;;  %v352_v47 = vshll.u32 %v990_v6, 16  ;;  %v917_v20 = vld [vmem:[%s981_s27 + $0x2c] ss:$0 sps:$4 sm:$0x11]  }
  0x19   : > { %860 = vmatpush3.bf16.msra.mxu0 %v921_v4  ;;  %887 = vmatpush3.bf16.msra.mxu1 %v921_v4  ;;  %v369_v48 = vshrl.u32 %v1022_v31, 16  ;;  %v319_v49 = vsel %vm295_vm2, %v314_v41, %v318_v37  ;;  %v362_v51 = vor.u32 %v361_v43, %v357_v34  ;;  %v371_v52 = vshll.u32 %v1022_v31, 16 }
  0x1a   : > { %861 = vmatprep.subr.bf16.mxu0 %v922_v12  ;;  %883 = vmatprep.subr.bf16.mxu1 %v922_v12  ;;  %v307_v50 = vsel %vm295_vm2, %v302_v42, %v306_v38  ;;  %v349_v56 = vrot.slane %v347_v46, 1  ;;  %v354_v57 = vrot.slane %v352_v47, 1  ;;  %v376_v58 = vshll.u32 %v1029_v40, 16 }
  0x1b   : > { %394 = vrot.lane.b32.xlu1 %v319_v49, %s932_s7  ;;  %v367_v60 = vsel %vm295_vm2, %v362_v51, %v366_v45  ;;  %v373_v61 = vrot.slane %v371_v52, 1  ;;  %v321_v62 = vshrl.u32 %v1040_v53, 16  ;;  %v323_v63 = vshll.u32 %v1040_v53, 16 }
  0x1c   : > { %392 = vrot.lane.b32.xlu0 %v307_v50, %s932_s7  ;;  %v350_v0 = vor.u32 %v349_v56, %v345_v44  ;;  %v378_v1 = vrot.slane %v376_v58, 1  ;;  %v328_v2 = vshll.u32 %v913_v54, 16  ;;  %v381_v3 = vshrl.u32 %v1044_v55, 16 }
  0x1d   : > { %862 = vmatpush3.bf16.msra.mxu0 %v922_v12  ;;  %888 = vmatpush3.bf16.msra.mxu1 %v922_v12  ;;  %v374_v4 = vor.u32 %v373_v61, %v369_v48  ;;  %v325_v6 = vrot.slane %v323_v63, 1  ;;  %v383_v9 = vshll.u32 %v1044_v55, 16  ;;  %v333_v10 = vshrl.u32 %v1049_v59, 16 }
  0x1e   : > { %v355_v12 = vsel %vm295_vm2, %v350_v0, %v354_v57  ;;  %v330_v13 = vrot.slane %v328_v2, 1  ;;  %v335_v15 = vshll.u32 %v1049_v59, 16  ;;  %v388_v19 = vshll.u32 %v915_v8, 16 }
  0x1f   : > { %402 = vrot.lane.b32.xlu1 %v367_v60, %s932_s7  ;;  %v379_v16 = vsel %vm295_vm2, %v374_v4, %v378_v1  ;;  %v326_v17 = vor.u32 %v325_v6, %v321_v62  ;;  %v385_v18 = vrot.slane %v383_v9, 1  ;;  %v340_v26 = vshll.u32 %v917_v20, 16 }
  0x20   : > { %400 = vrot.lane.b32.xlu0 %v355_v12, %s932_s7  ;;  %v337_v21 = vrot.slane %v335_v15, 1  ;;  %v390_v24 = vrot.slane %v388_v19, 1  ;;  %v427_v28 = vrot.slane %v1022_v31, 1  ;;  %v428_v29 = vrot.slane %v1029_v40, 1 }
  0x21   : > { %v331_v22 = vsel %vm295_vm2, %v326_v17, %v330_v13  ;;  %v386_v23 = vor.u32 %v385_v18, %v381_v3  ;;  %v342_v30 = vrot.slane %v340_v26, 1  ;;  %v415_v32 = vrot.slane %v1040_v53, 1 }
  0x22   : > { %v338_v25 = vor.u32 %v337_v21, %v333_v10  ;;  %v416_v33 = vrot.slane %v913_v54, 1  ;;  %v429_v35 = vsel %vm408_vm1, %v427_v28, %v428_v29  ;;  %v430_v36 = vrot.slane %v1044_v55, 1 }
  0x23   : > { %404 = vrot.lane.b32.xlu1 %v379_v16, %s932_s7  ;;  %v391_v27 = vsel %vm295_vm2, %v386_v23, %v390_v24  ;;  %v431_v37 = vrot.slane %v915_v8, 1  ;;  %v418_v39 = vrot.slane %v1049_v59, 1  ;;  %v419_v40 = vrot.slane %v917_v20, 1 }
  0x24   : > { %396 = vrot.lane.b32.xlu0 %v331_v22, %s932_s7  ;;  %v343_v34 = vsel %vm295_vm2, %v338_v25, %v342_v30  ;;  %v417_v38 = vsel %vm408_vm1, %v415_v32, %v416_v33  ;;  %v683_v10 = vlaneseq }
  0x25   : > { %v432_v41 = vsel %vm408_vm1, %v430_v36, %v431_v37  ;;  %v420_v42 = vsel %vm408_vm1, %v418_v39, %v419_v40 }
  0x26   : > { %v684_v12 = vand.u32 127, %v683_v10 }
  0x27   : > { %406 = vrot.lane.b32.xlu1 %v391_v27, %s932_s7 }
  0x28   : > { %398 = vrot.lane.b32.xlu0 %v343_v34, %s932_s7  ;;  %vm685_vm6 = vcmp.ge.s32.totalorder %v684_v12, 8  ;;  %vm686_vm7 = vcmp.lt.s32.totalorder %v684_v12, 12 }
  0x29   : > { %vm1131_vm8 = vmand %vm685_vm6, %vm686_vm7 }
  0x2b   : > { %445 = vrot.lane.b32.xlu1 %v429_v35, %s931_s6 }
  0x2c   : > { %437 = vrot.lane.b32.xlu0 %v417_v38, %s931_s6 }
  0x2f   : > { %447 = vrot.lane.b32.xlu1 %v432_v41, %s931_s6 }
  0x30   : > { %439 = vrot.lane.b32.xlu0 %v420_v42, %s931_s6 }
  0x85   : > { %v442_v43 = vpop.permute.xlu1 %441 }
  0x86   : > { %v434_v44 = vpop.permute.xlu0 %433 }
  0x89   : > { %v444_v45 = vpop.permute.xlu1 %443 }
  0x8a   : > { %v436_v46 = vpop.permute.xlu0 %435 }
  0x8d   : > { %v395_v47 = vpop.permute.xlu1 %394 }
  0x8e   : > { %v453_v48 = vsel %vm449_vm3, %v1006_v14, %v395_v47  ;;  %v393_v49 = vpop.permute.xlu0 %392 }
  0x8f   : > { %v451_v50 = vsel %vm449_vm3, %v993_v7, %v393_v49  ;;  %v470_v51 = vsel %vm466_vm4, %v453_v48, %v436_v46 }
  0x90   : > { %v468_v52 = vsel %vm466_vm4, %v451_v50, %v434_v44 }
  0x91   : > { %863 = vmatprep.mubr.msk.bf16.mxu0 %vm519_vm5, %v468_v52  ;;  %v403_v54 = vpop.permute.xlu1 %402 }
  0x92   : > { %v461_v56 = vsel %vm449_vm3, %v999_v11, %v403_v54  ;;  %864 = vmatmul.mubr.msk.bf16.vlgmr.msra.gmra.mxu0 %vm519_vm5, %v470_v51  ;;  %v401_v57 = vpop.permute.xlu0 %400 }
  0x93   : > { %v459_v14 = vsel %vm449_vm3, %v987_v5, %v401_v57  ;;  %v478_v58 = vsel %vm466_vm4, %v461_v56, %v444_v45 }
  0x94   : > { %v476_v7 = vsel %vm466_vm4, %v459_v14, %v442_v43 }
  0x95   : > { %871 = vmatprep.mubr.msk.bf16.mxu1 %vm519_vm5, %v476_v7  ;;  %v405_v60 = vpop.permute.xlu1 %404 }
  0x96   : > { %872 = vmatmul.mubr.msk.bf16.vlgmr.msra.gmra.mxu1 %vm519_vm5, %v478_v58  ;;  %v397_v61 = vpop.permute.xlu0 %396  ;;  %v463_v11 = vsel %vm449_vm3, %v1022_v31, %v405_v60 }
  0x97   : > { %v455_v1 = vsel %vm449_vm3, %v1040_v53, %v397_v61 }
  0x99   : > { %v407_v62 = vpop.permute.xlu1 %406 }
  0x9a   : > { %v399_v63 = vpop.permute.xlu0 %398  ;;  %v465_v4 = vsel %vm449_vm3, %v1044_v55, %v407_v62  ;;  %v1120_v55 = vld [vmem:[%s1222_s2] ss:$0 sm:$0xff] }
  0x9b   : > { %v457_v31 = vsel %vm449_vm3, %v1049_v59, %v399_v63  ;;  %v1125_v59 = vld [vmem:[%s1223_s3] ss:$0 sm:$0xff] }
  0x9d   : > { %v446_v0 = vpop.permute.xlu1 %445 }
  0x9e   : > { %v480_v5 = vsel %vm466_vm4, %v463_v11, %v446_v0  ;;  %v438_v2 = vpop.permute.xlu0 %437 }
  0x9f   : > { %v472_v3 = vsel %vm466_vm4, %v455_v1, %v438_v2  ;;  %875 = vmatprep.mubr.msk.bf16.mxu1 %vm519_vm5, %v480_v5 }
  0xa0   : > { %867 = vmatprep.mubr.msk.bf16.mxu0 %vm519_vm5, %v472_v3 }
  0xa1   : > { %v448_v6 = vpop.permute.xlu1 %447 }
  0xa2   : > { %v482_v8 = vsel %vm466_vm4, %v465_v4, %v448_v6  ;;  %v440_v53 = vpop.permute.xlu0 %439 }
  0xa3   : > { %v474_v9 = vsel %vm466_vm4, %v457_v31, %v440_v53  ;;  %876 = vmatmul.mubr.msk.bf16.gmra.mxu1 %vm519_vm5, %v482_v8 }
  0xa4   : > { %868 = vmatmul.mubr.msk.bf16.gmra.mxu0 %vm519_vm5, %v474_v9 }
 0x152   : > { %v865_v13 = vpop.f32.mrf.mxu0 }
 0x153   : > { %v646_v15 = vmul.f32 %v865_v13, %v1120_v55 }
 0x154   : > { %v574_v16 = vpop.f32.mrf.mxu0 }
 0x155   : > { %v669_v17 = vadd.f32 %v1125_v59, %v646_v15  ;;  %v644_v18 = vmul.f32 %v1120_v55, %v574_v16 }
 0x156   : > { %v866_v20 = vpop.f32.mrf.mxu0  ;;  %v873_v21 = vpop.f32.mrf.mxu1 }
 0x157   : > { %v690_v22 = vmax.f32 %v669_v17, 0.0  ;;  %v667_v23 = vadd.f32 %v1125_v59, %v644_v18  ;;  %v647_v24 = vmul.f32 %v866_v20, %v1120_v55  ;;  %v654_v25 = vmul.f32 %v873_v21, %v1120_v55 }
 0x158   : > { %v577_v26 = vpop.f32.mrf.mxu0  ;;  %v606_v27 = vpop.f32.mrf.mxu1 }
 0x159   : > { %v708_v28 = vsel %vm1131_vm8, %v690_v22, %v669_v17  ;;  %v688_v29 = vmax.f32 %v667_v23, 0.0  ;;  %v670_v30 = vadd.f32 %v1125_v59, %v647_v24  ;;  %v677_v32 = vadd.f32 %v1125_v59, %v654_v25 }
 0x15a   : > { %724 = vst [vmem:[%s1138_s16 + $0x10] sm:$0xff] %v708_v28  ;;  %v645_v33 = vmul.f32 %v1120_v55, %v577_v26  ;;  %v652_v34 = vmul.f32 %v1120_v55, %v606_v27  ;;  %v874_v35 = vpop.f32.mrf.mxu1 }
 0x15b   : > { %v706_v36 = vsel %vm1131_vm8, %v688_v29, %v667_v23  ;;  %v691_v37 = vmax.f32 %v670_v30, 0.0  ;;  %v698_v38 = vmax.f32 %v677_v32, 0.0  ;;  %v655_v39 = vmul.f32 %v874_v35, %v1120_v55 }
 0x15c   : > { %722 = vst [vmem:[%s1138_s16] sm:$0xff] %v706_v36  ;;  %v668_v40 = vadd.f32 %v1125_v59, %v645_v33  ;;  %v675_v41 = vadd.f32 %v1125_v59, %v652_v34  ;;  %v609_v42 = vpop.f32.mrf.mxu1 }
 0x15d   : > { %v709_v43 = vsel %vm1131_vm8, %v691_v37, %v670_v30  ;;  %v716_v44 = vsel %vm1131_vm8, %v698_v38, %v677_v32  ;;  %v678_v45 = vadd.f32 %v1125_v59, %v655_v39  ;;  %v653_v46 = vmul.f32 %v1120_v55, %v609_v42 }
 0x15e   : > { %725 = vst [vmem:[%s1138_s16 + $0x18] sm:$0xff] %v709_v43  ;;  %732 = vst [vmem:[%s1138_s16 + $0x50] sm:$0xff] %v716_v44  ;;  %v689_v47 = vmax.f32 %v668_v40, 0.0  ;;  %v696_v48 = vmax.f32 %v675_v41, 0.0 }
 0x15f   : > { %v699_v49 = vmax.f32 %v678_v45, 0.0  ;;  %v676_v50 = vadd.f32 %v1125_v59, %v653_v46 }
 0x160   : > { %v707_v51 = vsel %vm1131_vm8, %v689_v47, %v668_v40  ;;  %v714_v52 = vsel %vm1131_vm8, %v696_v48, %v675_v41 }
 0x161   : > { %723 = vst [vmem:[%s1138_s16 + $0x8] sm:$0xff] %v707_v51  ;;  %730 = vst [vmem:[%s1138_s16 + $0x40] sm:$0xff] %v714_v52  ;;  %v717_v54 = vsel %vm1131_vm8, %v699_v49, %v678_v45  ;;  %v697_v56 = vmax.f32 %v676_v50, 0.0 }
 0x162   : > { %733 = vst [vmem:[%s1138_s16 + $0x58] sm:$0xff] %v717_v54 }
 0x163   : > { %v715_v57 = vsel %vm1131_vm8, %v697_v56, %v676_v50  ;;  %v877_v14 = vpop.f32.mrf.mxu1 }
 0x164   : > { %731 = vst [vmem:[%s1138_s16 + $0x48] sm:$0xff] %v715_v57  ;;  %v869_v58 = vpop.f32.mrf.mxu0  ;;  %v658_v7 = vmul.f32 %v877_v14, %v1120_v55 }
 0x165   : > { %v650_v60 = vmul.f32 %v869_v58, %v1120_v55  ;;  %v622_v61 = vpop.f32.mrf.mxu1 }
 0x166   : > { %v681_v62 = vadd.f32 %v1125_v59, %v658_v7  ;;  %v590_v63 = vpop.f32.mrf.mxu0  ;;  %v656_v11 = vmul.f32 %v1120_v55, %v622_v61 }
 0x167   : > { %v673_v0 = vadd.f32 %v1125_v59, %v650_v60  ;;  %v648_v1 = vmul.f32 %v1120_v55, %v590_v63  ;;  %v878_v5 = vpop.f32.mrf.mxu1 }
 0x168   : > { %v702_v2 = vmax.f32 %v681_v62, 0.0  ;;  %v679_v3 = vadd.f32 %v1125_v59, %v656_v11  ;;  %v870_v4 = vpop.f32.mrf.mxu0  ;;  %v659_v6 = vmul.f32 %v878_v5, %v1120_v55 }
 0x169   : > { %v694_v31 = vmax.f32 %v673_v0, 0.0  ;;  %v671_v8 = vadd.f32 %v1125_v59, %v648_v1  ;;  %v651_v53 = vmul.f32 %v870_v4, %v1120_v55  ;;  %v625_v9 = vpop.f32.mrf.mxu1 }
 0x16a   : > { %v720_v10 = vsel %vm1131_vm8, %v702_v2, %v681_v62  ;;  %v700_v12 = vmax.f32 %v679_v3, 0.0  ;;  %v682_v13 = vadd.f32 %v1125_v59, %v659_v6  ;;  %v593_v15 = vpop.f32.mrf.mxu0  ;;  %v657_v16 = vmul.f32 %v1120_v55, %v625_v9 }
 0x16b   : > { %v712_v17 = vsel %vm1131_vm8, %v694_v31, %v673_v0  ;;  %736 = vst [vmem:[%s1138_s16 + $0x70] sm:$0xff] %v720_v10  ;;  %v692_v18 = vmax.f32 %v671_v8, 0.0  ;;  %v674_v20 = vadd.f32 %v1125_v59, %v651_v53  ;;  %v649_v21 = vmul.f32 %v1120_v55, %v593_v15 }
 0x16c   : > { %728 = vst [vmem:[%s1138_s16 + $0x30] sm:$0xff] %v712_v17  ;;  %v718_v22 = vsel %vm1131_vm8, %v700_v12, %v679_v3  ;;  %v703_v23 = vmax.f32 %v682_v13, 0.0  ;;  %v680_v24 = vadd.f32 %v1125_v59, %v657_v16 }
 0x16d   : > { %v710_v25 = vsel %vm1131_vm8, %v692_v18, %v671_v8  ;;  %734 = vst [vmem:[%s1138_s16 + $0x60] sm:$0xff] %v718_v22  ;;  %v695_v26 = vmax.f32 %v674_v20, 0.0  ;;  %v672_v27 = vadd.f32 %v1125_v59, %v649_v21 }
 0x16e   : > { %726 = vst [vmem:[%s1138_s16 + $0x20] sm:$0xff] %v710_v25  ;;  %v721_v55 = vsel %vm1131_vm8, %v703_v23, %v682_v13  ;;  %v701_v28 = vmax.f32 %v680_v24, 0.0 }
 0x16f   : > { %v713_v29 = vsel %vm1131_vm8, %v695_v26, %v674_v20  ;;  %737 = vst [vmem:[%s1138_s16 + $0x78] sm:$0xff] %v721_v55  ;;  %v693_v30 = vmax.f32 %v672_v27, 0.0 }
 0x170   : > { %729 = vst [vmem:[%s1138_s16 + $0x38] sm:$0xff] %v713_v29  ;;  %v719_v32 = vsel %vm1131_vm8, %v701_v28, %v680_v24 }
 0x171   : > { %v711_v33 = vsel %vm1131_vm8, %v693_v30, %v672_v27  ;;  %735 = vst [vmem:[%s1138_s16 + $0x68] sm:$0xff] %v719_v32 }
 0x172   : > { %727 = vst [vmem:[%s1138_s16 + $0x28] sm:$0xff] %v711_v33 }
 0x173 PF: > { %s14_s15 = sadd.s32 1, %s929_s15  }
 0x174   : > { %p11_p4 = scmp.ge.s32.totalorder %s14_s15, 6  }
 0x176   :  { %13 = sbr.rel (!%p11_p4) target bundleno = 1 (0x1), region = 66 }

// kernel: reverse.0
= control target key start
LH: loop header
LB: loop body
LE: loop exit
PB: predicated region body
PF: predicated region fallthrough
CT: control target
= control target key end

     0   :  { %v2_v0 = vlaneseq  ;;  %s414_s0 = inlined_call_operand.vmem [shape: f32[2,16,4,7], index: 0, kind: input, shape index: {}]   ;;  %s415_s1 = inlined_call_operand.vmem [shape: f32[2,16,4,7], index: 1, kind: output, shape index: {}]  }
   0x1   :  { %v67_v2 = vld [vmem:[%s414_s0 + $0x10] sm:$0xff]  ;;  %v63_v3 = vld [vmem:[%s414_s0] sm:$0xff]  ;;  %v69_v4 = vld [vmem:[%s414_s0 + $0x18] sm:$0xff] }
   0x2   :  { %v3_v1 = vsub.s32 6, %v2_v0  ;;  %v65_v5 = vld [vmem:[%s414_s0 + $0x8] sm:$0xff]  ;;  %v71_v7 = vld [vmem:[%s414_s0 + $0x20] sm:$0xff]  ;;  %v77_v8 = vld [vmem:[%s414_s0 + $0x38] sm:$0xff] }
   0x3   :  { %v73_v6 = vld [vmem:[%s414_s0 + $0x28] sm:$0xff]  ;;  %v75_v9 = vld [vmem:[%s414_s0 + $0x30] sm:$0xff]  ;;  %v79_v11 = vld [vmem:[%s414_s0 + $0x40] sm:$0xff] }
   0x4   :  { %4 = vset.pattern.permute.xlu0 %v3_v1  ;;  %307 = vset.pattern.permute.xlu1 %v3_v1  ;;  %v81_v10 = vld [vmem:[%s414_s0 + $0x48] sm:$0xff]  ;;  %v85_v12 = vld [vmem:[%s414_s0 + $0x58] sm:$0xff]  ;;  %v83_v13 = vld [vmem:[%s414_s0 + $0x50] sm:$0xff] }
   0x5   :  { %111 = vperm.xlu1 %307, %v67_v2   ;;  %99 = vperm.xlu0 %4, %v63_v3   ;;  %v89_v14 = vld [vmem:[%s414_s0 + $0x68] sm:$0xff]  ;;  %v87_v15 = vld [vmem:[%s414_s0 + $0x60] sm:$0xff]  ;;  %v93_v16 = vld [vmem:[%s414_s0 + $0x78] sm:$0xff] }
   0x6   :  { %v91_v17 = vld [vmem:[%s414_s0 + $0x70] sm:$0xff] }
   0x9   :  { %117 = vperm.xlu1 %307, %v69_v4   ;;  %105 = vperm.xlu0 %4, %v65_v5  }
   0xd   :  { %129 = vperm.xlu1 %307, %v73_v6   ;;  %123 = vperm.xlu0 %4, %v71_v7  }
  0x11   :  { %141 = vperm.xlu1 %307, %v77_v8   ;;  %135 = vperm.xlu0 %4, %v75_v9  }
  0x15   :  { %153 = vperm.xlu1 %307, %v81_v10   ;;  %147 = vperm.xlu0 %4, %v79_v11  }
  0x19   :  { %165 = vperm.xlu1 %307, %v85_v12   ;;  %159 = vperm.xlu0 %4, %v83_v13  }
  0x1d   :  { %177 = vperm.xlu1 %307, %v89_v14   ;;  %171 = vperm.xlu0 %4, %v87_v15  }
  0x21   :  { %189 = vperm.xlu1 %307, %v93_v16   ;;  %183 = vperm.xlu0 %4, %v91_v17  }
  0x80   :  { %v112_v18 = vpop.permute.xlu1 %111  ;;  %v100_v19 = vpop.permute.xlu0 %99 }
  0x81   :  { %255 = vst [vmem:[%s415_s1 + $0x10] sm:$0xff] %v112_v18  ;;  %251 = vst [vmem:[%s415_s1] sm:$0xff] %v100_v19 }
  0x84   :  { %v118_v20 = vpop.permute.xlu1 %117  ;;  %v106_v21 = vpop.permute.xlu0 %105 }
  0x85   :  { %257 = vst [vmem:[%s415_s1 + $0x18] sm:$0xff] %v118_v20  ;;  %253 = vst [vmem:[%s415_s1 + $0x8] sm:$0xff] %v106_v21 }
  0x88   :  { %v130_v22 = vpop.permute.xlu1 %129  ;;  %v124_v23 = vpop.permute.xlu0 %123 }
  0x89   :  { %261 = vst [vmem:[%s415_s1 + $0x28] sm:$0xff] %v130_v22  ;;  %259 = vst [vmem:[%s415_s1 + $0x20] sm:$0xff] %v124_v23 }
  0x8c   :  { %v142_v24 = vpop.permute.xlu1 %141  ;;  %v136_v25 = vpop.permute.xlu0 %135 }
  0x8d   :  { %265 = vst [vmem:[%s415_s1 + $0x38] sm:$0xff] %v142_v24  ;;  %263 = vst [vmem:[%s415_s1 + $0x30] sm:$0xff] %v136_v25 }
  0x90   :  { %v154_v26 = vpop.permute.xlu1 %153  ;;  %v148_v27 = vpop.permute.xlu0 %147 }
  0x91   :  { %269 = vst [vmem:[%s415_s1 + $0x48] sm:$0xff] %v154_v26  ;;  %267 = vst [vmem:[%s415_s1 + $0x40] sm:$0xff] %v148_v27 }
  0x94   :  { %v166_v28 = vpop.permute.xlu1 %165  ;;  %v160_v29 = vpop.permute.xlu0 %159 }
  0x95   :  { %273 = vst [vmem:[%s415_s1 + $0x58] sm:$0xff] %v166_v28  ;;  %271 = vst [vmem:[%s415_s1 + $0x50] sm:$0xff] %v160_v29 }
  0x98   :  { %v178_v30 = vpop.permute.xlu1 %177  ;;  %v172_v31 = vpop.permute.xlu0 %171 }
  0x99   :  { %277 = vst [vmem:[%s415_s1 + $0x68] sm:$0xff] %v178_v30  ;;  %275 = vst [vmem:[%s415_s1 + $0x60] sm:$0xff] %v172_v31 }
  0x9c   :  { %v190_v32 = vpop.permute.xlu1 %189  ;;  %v184_v33 = vpop.permute.xlu0 %183 }
  0x9d   :  { %281 = vst [vmem:[%s415_s1 + $0x78] sm:$0xff] %v190_v32  ;;  %279 = vst [vmem:[%s415_s1 + $0x70] sm:$0xff] %v184_v33 }

// kernel: ffc_forward.5
= control target key start
LH: loop header
LB: loop body
LE: loop exit
PB: predicated region body
PF: predicated region fallthrough
CT: control target
= control target key end

     0   :  { %s1362_s15 = smov 0   ;;  %s1364_s16 = smov 0   ;;  %s1684_s0 = inlined_call_operand.vmem [shape: bf16[288,8], index: 0, kind: input, shape index: {}]   ;;  %s1685_s1 = inlined_call_operand.vmem [shape: bf16[8,128], index: 1, kind: input, shape index: {}]   ;;  %s1686_s2 = inlined_call_operand.vmem [shape: f32[1,128], index: 2, kind: input, shape index: {}]   ;;  %s1687_s3 = inlined_call_operand.vmem [shape: f32[1,128], index: 3, kind: input, shape index: {}]   ;;  %s1688_s4 = inlined_call_operand.vmem [shape: f32[288,128], index: 4, kind: output, shape index: {}]  }
   0x1   :  { %s1366_s17 = smov 0  }
   0x2 LB: > { %s1375_s18 = sadd.s32 4294967295, %s1303_s17   ;;  %s1377_s19 = sadd.s32 1, %s1303_s17   ;;  %s1303_s17 = sphi %s1366_s17, %s1697_s17   ;;  %s1299_s16 = sphi %s1364_s16, %s1696_s16   ;;  %s1295_s15 = sphi %s1362_s15, %s1695_s15  }
   0x3   : > { %s107_s20 = ssub.s32 %s1303_s17, %s1377_s19  ;;  %s110_s21 = sadd.s32 1, %s1299_s16 }
   0x4   : > { %p108_p0 = scmp.eq.s32.totalorder %s107_s20, 0  ;;  %p120_p1 = scmp.ne.s32.totalorder %s1299_s16, %s1295_s15 }
   0x5   : > { %p121_p2 = scmp.eq.s32.totalorder %s1375_s18, 1  ;;  %p1032_p3 = scmp.ge.s32.totalorder %s1303_s17, 1 }
   0x6   : > { %s1385_s22 = scalar_select %p108_p0, %s1299_s16, %s110_s21  }
   0x7   : > { %p1387_p4 = por %p121_p2, %p120_p1  ;;  %p171_p5 = scmp.lt.s32.totalorder %s1303_s17, 3 }
   0x9   : > { %p172_p6 = pnand %p1032_p3, %p171_p5 }
   0xa   : > { %s1395_s26 = sshll.u32 (!%p172_p6), %s1375_s18, 5  ;;  %s197_s6 = sand.u32 (!%p172_p6), 1, %s1295_s15  }
   0xb   : > { %175 = sbr.rel (%p172_p6) target bundleno = 301 (0x12d), region = 36  ;;  %p205_p7 = scmp.lt.s32.totalorder (!%p172_p6), %s1395_s26, 35 }
   0xc   : > { %s1033_s11 = sshll.u32 (!%p172_p6), %s197_s6, 8 }
   0xd   : > { %s1457_s12 = scalar_lea.vmem (!%p172_p6), [#allocation2], %s1033_s11  }
  0x10   : > { %v252_v0 = vld [vmem:[%s1685_s1] sm:$0xf]  ;;  %vm382_vm0 = vcmask 1043456   ;;  %s206_s27 = scalar_select %p205_p7, %s1395_s26, 35  ;;  %vm333_vm1 = vcmask 64512  }
  0x11   : > { %1143 = vmatprep.subr.msk.bf16.mxu0 %vm382_vm0, %v252_v0  ;;  %1144 = vmatprep.subr.msk.bf16.mxu1 %vm382_vm0, %v252_v0  ;;  %v384_v1 = vsel %vm382_vm0, %v252_v0, 0  ;;  %v1440_v18 = vld [vmem:[%s1686_s2] ss:$0 sm:$0xff]  ;;  %s697_s13 = ssub.s32 (%p1387_p4), 36, %s1395_s26  ;;  %s1087_s14 = sshll.u32 (%p1387_p4), %s1375_s18, 8 }
  0x12   : > { %1108 = vmatpush3.bf16.msra.mxu0 %v384_v1  ;;  %1142 = vmatpush3.bf16.msra.mxu1 %v384_v1  ;;  %s1035_s28 = sshll.u32 %s206_s27, 2  ;;  %v1445_v20 = vld [vmem:[%s1687_s3] ss:$0 sm:$0xff]  ;;  %p698_p8 = scmp.lt.s32.totalorder (%p1387_p4), %s697_s13, 32 }
  0x13   : > { %s1402_s5 = scalar_lea.vmem %s1684_s0, %s1035_s28  ;;  %s1552_s20 = scalar_lea.vmem (%p1387_p4), %s1688_s4, %s1087_s14  }
  0x14   : > { %v1233_v2 = vld [vmem:[%s1402_s5] sm:$0xff]   ;;  %v1235_v4 = vld [vmem:[%s1402_s5 + $0x8] sm:$0xff]   ;;  %v1237_v6 = vld [vmem:[%s1402_s5 + $0x10] sm:$0xff]  }
  0x15   : > { %v1234_v3 = vld [vmem:[%s1402_s5 + $0x40] sm:$0xff]   ;;  %1109 = vmatprep.mubr.msk.bf16.mxu0 %vm333_vm1, %v1233_v2  ;;  %v1236_v5 = vld [vmem:[%s1402_s5 + $0x48] sm:$0xff]   ;;  %v1238_v7 = vld [vmem:[%s1402_s5 + $0x50] sm:$0xff]  }
  0x16   : > { %1125 = vmatprep.mubr.msk.bf16.mxu1 %vm333_vm1, %v1234_v3  ;;  %1110 = vmatmul.mubr.msk.bf16.vlgmr.msra.gmra.mxu0 %vm333_vm1, %v1235_v4  ;;  %v1239_v8 = vld [vmem:[%s1402_s5 + $0x18] sm:$0xff]   ;;  %v1241_v10 = vld [vmem:[%s1402_s5 + $0x20] sm:$0xff]   ;;  %v1243_v12 = vld [vmem:[%s1402_s5 + $0x28] sm:$0xff]  }
  0x17   : > { %1126 = vmatmul.mubr.msk.bf16.vlgmr.msra.gmra.mxu1 %vm333_vm1, %v1236_v5  ;;  %1113 = vmatprep.mubr.msk.bf16.mxu0 %vm333_vm1, %v1237_v6  ;;  %v1240_v9 = vld [vmem:[%s1402_s5 + $0x58] sm:$0xff]   ;;  %v1242_v11 = vld [vmem:[%s1402_s5 + $0x60] sm:$0xff]   ;;  %v1244_v13 = vld [vmem:[%s1402_s5 + $0x68] sm:$0xff]  }
  0x18   : > { %1129 = vmatprep.mubr.msk.bf16.mxu1 %vm333_vm1, %v1238_v7  ;;  %v1245_v14 = vld [vmem:[%s1402_s5 + $0x30] sm:$0xff]   ;;  %v1247_v16 = vld [vmem:[%s1402_s5 + $0x38] sm:$0xff]  }
  0x19   : > { %v1246_v15 = vld [vmem:[%s1402_s5 + $0x70] sm:$0xff]   ;;  %v1248_v17 = vld [vmem:[%s1402_s5 + $0x78] sm:$0xff]  }
  0x1e   : > { %1114 = vmatmul.mubr.msk.bf16.gmra.mxu0 %vm333_vm1, %v1239_v8 }
  0x1f   : > { %1130 = vmatmul.mubr.msk.bf16.gmra.mxu1 %vm333_vm1, %v1240_v9  ;;  %1117 = vmatprep.mubr.msk.bf16.mxu0 %vm333_vm1, %v1241_v10 }
  0x20   : > { %1133 = vmatprep.mubr.msk.bf16.mxu1 %vm333_vm1, %v1242_v11 }
  0x26   : > { %1118 = vmatmul.mubr.msk.bf16.gmra.mxu0 %vm333_vm1, %v1243_v12 }
  0x27   : > { %1134 = vmatmul.mubr.msk.bf16.gmra.mxu1 %vm333_vm1, %v1244_v13  ;;  %1121 = vmatprep.mubr.msk.bf16.mxu0 %vm333_vm1, %v1245_v14 }
  0x28   : > { %1137 = vmatprep.mubr.msk.bf16.mxu1 %vm333_vm1, %v1246_v15 }
  0x2e   : > { %1122 = vmatmul.mubr.msk.bf16.gmra.mxu0 %vm333_vm1, %v1247_v16 }
  0x2f   : > { %1138 = vmatmul.mubr.msk.bf16.gmra.mxu1 %vm333_vm1, %v1248_v17 }
  0xd6   : > { %v1111_v19 = vpop.f32.mrf.mxu0 }
  0xd7   : > { %v556_v21 = vmul.f32 %v1111_v19, %v1440_v18  ;;  %v1127_v22 = vpop.f32.mrf.mxu1 }
  0xd8   : > { %v572_v23 = vmul.f32 %v1127_v22, %v1440_v18  ;;  %v420_v24 = vpop.f32.mrf.mxu0 }
  0xd9   : > { %v595_v25 = vadd.f32 %v1445_v20, %v556_v21  ;;  %v554_v26 = vmul.f32 %v1440_v18, %v420_v24  ;;  %v484_v27 = vpop.f32.mrf.mxu1 }
  0xda   : > { %v611_v28 = vadd.f32 %v1445_v20, %v572_v23  ;;  %v570_v29 = vmul.f32 %v1440_v18, %v484_v27  ;;  %v1112_v30 = vpop.f32.mrf.mxu0 }
  0xdb   : > { %v627_v31 = vmax.f32 %v595_v25, 0.0  ;;  %v593_v32 = vadd.f32 %v1445_v20, %v554_v26  ;;  %v557_v33 = vmul.f32 %v1112_v30, %v1440_v18  ;;  %v1128_v34 = vpop.f32.mrf.mxu1 }
  0xdc   : > { %v643_v35 = vmax.f32 %v611_v28, 0.0  ;;  %v609_v36 = vadd.f32 %v1445_v20, %v570_v29  ;;  %v573_v37 = vmul.f32 %v1128_v34, %v1440_v18  ;;  %v423_v38 = vpop.f32.mrf.mxu0 }
  0xdd   : > { %659 = vst [vmem:[%s1457_s12 + $0x10] sm:$0xff] %v627_v31  ;;  %v625_v39 = vmax.f32 %v593_v32, 0.0  ;;  %v596_v40 = vadd.f32 %v1445_v20, %v557_v33  ;;  %v555_v41 = vmul.f32 %v1440_v18, %v423_v38  ;;  %v487_v42 = vpop.f32.mrf.mxu1 }
  0xde   : > { %675 = vst [vmem:[%s1457_s12 + $0x90] sm:$0xff] %v643_v35  ;;  %v641_v43 = vmax.f32 %v609_v36, 0.0  ;;  %v612_v44 = vadd.f32 %v1445_v20, %v573_v37  ;;  %v571_v45 = vmul.f32 %v1440_v18, %v487_v42  ;;  %v1115_v46 = vpop.f32.mrf.mxu0 }
  0xdf   : > { %657 = vst [vmem:[%s1457_s12] sm:$0xff] %v625_v39  ;;  %v628_v47 = vmax.f32 %v596_v40, 0.0  ;;  %v594_v48 = vadd.f32 %v1445_v20, %v555_v41  ;;  %v560_v49 = vmul.f32 %v1115_v46, %v1440_v18  ;;  %v1131_v50 = vpop.f32.mrf.mxu1 }
  0xe0   : > { %673 = vst [vmem:[%s1457_s12 + $0x80] sm:$0xff] %v641_v43  ;;  %v644_v51 = vmax.f32 %v612_v44, 0.0  ;;  %v610_v52 = vadd.f32 %v1445_v20, %v571_v45  ;;  %v576_v53 = vmul.f32 %v1131_v50, %v1440_v18  ;;  %v436_v54 = vpop.f32.mrf.mxu0 }
  0xe1   : > { %660 = vst [vmem:[%s1457_s12 + $0x18] sm:$0xff] %v628_v47  ;;  %v626_v55 = vmax.f32 %v594_v48, 0.0  ;;  %v599_v56 = vadd.f32 %v1445_v20, %v560_v49  ;;  %v558_v57 = vmul.f32 %v1440_v18, %v436_v54  ;;  %v500_v58 = vpop.f32.mrf.mxu1 }
  0xe2   : > { %676 = vst [vmem:[%s1457_s12 + $0x98] sm:$0xff] %v644_v51  ;;  %v642_v59 = vmax.f32 %v610_v52, 0.0  ;;  %v615_v60 = vadd.f32 %v1445_v20, %v576_v53  ;;  %v574_v61 = vmul.f32 %v1440_v18, %v500_v58  ;;  %v1116_v62 = vpop.f32.mrf.mxu0 }
  0xe3   : > { %658 = vst [vmem:[%s1457_s12 + $0x8] sm:$0xff] %v626_v55  ;;  %v631_v63 = vmax.f32 %v599_v56, 0.0  ;;  %v597_v0 = vadd.f32 %v1445_v20, %v558_v57  ;;  %v561_v1 = vmul.f32 %v1116_v62, %v1440_v18  ;;  %v1132_v2 = vpop.f32.mrf.mxu1 }
  0xe4   : > { %674 = vst [vmem:[%s1457_s12 + $0x88] sm:$0xff] %v642_v59  ;;  %v647_v3 = vmax.f32 %v615_v60, 0.0  ;;  %v613_v4 = vadd.f32 %v1445_v20, %v574_v61  ;;  %v577_v5 = vmul.f32 %v1132_v2, %v1440_v18  ;;  %v439_v6 = vpop.f32.mrf.mxu0 }
  0xe5   : > { %663 = vst [vmem:[%s1457_s12 + $0x30] sm:$0xff] %v631_v63  ;;  %v629_v7 = vmax.f32 %v597_v0, 0.0  ;;  %v600_v8 = vadd.f32 %v1445_v20, %v561_v1  ;;  %v559_v9 = vmul.f32 %v1440_v18, %v439_v6  ;;  %v503_v10 = vpop.f32.mrf.mxu1 }
  0xe6   : > { %679 = vst [vmem:[%s1457_s12 + $0xb0] sm:$0xff] %v647_v3  ;;  %v645_v11 = vmax.f32 %v613_v4, 0.0  ;;  %v616_v12 = vadd.f32 %v1445_v20, %v577_v5  ;;  %v575_v13 = vmul.f32 %v1440_v18, %v503_v10  ;;  %v1119_v14 = vpop.f32.mrf.mxu0 }
  0xe7   : > { %661 = vst [vmem:[%s1457_s12 + $0x20] sm:$0xff] %v629_v7  ;;  %v632_v15 = vmax.f32 %v600_v8, 0.0  ;;  %v598_v16 = vadd.f32 %v1445_v20, %v559_v9  ;;  %v564_v17 = vmul.f32 %v1119_v14, %v1440_v18  ;;  %v1135_v19 = vpop.f32.mrf.mxu1 }
  0xe8   : > { %677 = vst [vmem:[%s1457_s12 + $0xa0] sm:$0xff] %v645_v11  ;;  %v648_v21 = vmax.f32 %v616_v12, 0.0  ;;  %v614_v22 = vadd.f32 %v1445_v20, %v575_v13  ;;  %v580_v23 = vmul.f32 %v1135_v19, %v1440_v18  ;;  %v452_v24 = vpop.f32.mrf.mxu0 }
  0xe9   : > { %664 = vst [vmem:[%s1457_s12 + $0x38] sm:$0xff] %v632_v15  ;;  %v630_v25 = vmax.f32 %v598_v16, 0.0  ;;  %v603_v26 = vadd.f32 %v1445_v20, %v564_v17  ;;  %v562_v27 = vmul.f32 %v1440_v18, %v452_v24  ;;  %v516_v28 = vpop.f32.mrf.mxu1 }
  0xea   : > { %680 = vst [vmem:[%s1457_s12 + $0xb8] sm:$0xff] %v648_v21  ;;  %v646_v29 = vmax.f32 %v614_v22, 0.0  ;;  %v619_v30 = vadd.f32 %v1445_v20, %v580_v23  ;;  %v578_v31 = vmul.f32 %v1440_v18, %v516_v28  ;;  %v1120_v32 = vpop.f32.mrf.mxu0 }
  0xeb   : > { %662 = vst [vmem:[%s1457_s12 + $0x28] sm:$0xff] %v630_v25  ;;  %v635_v33 = vmax.f32 %v603_v26, 0.0  ;;  %v601_v34 = vadd.f32 %v1445_v20, %v562_v27  ;;  %v565_v35 = vmul.f32 %v1120_v32, %v1440_v18  ;;  %v1136_v36 = vpop.f32.mrf.mxu1 }
  0xec   : > { %678 = vst [vmem:[%s1457_s12 + $0xa8] sm:$0xff] %v646_v29  ;;  %v651_v37 = vmax.f32 %v619_v30, 0.0  ;;  %v617_v38 = vadd.f32 %v1445_v20, %v578_v31  ;;  %v581_v39 = vmul.f32 %v1136_v36, %v1440_v18  ;;  %v455_v40 = vpop.f32.mrf.mxu0 }
  0xed   : > { %667 = vst [vmem:[%s1457_s12 + $0x50] sm:$0xff] %v635_v33  ;;  %v633_v41 = vmax.f32 %v601_v34, 0.0  ;;  %v604_v42 = vadd.f32 %v1445_v20, %v565_v35  ;;  %v563_v43 = vmul.f32 %v1440_v18, %v455_v40  ;;  %v519_v44 = vpop.f32.mrf.mxu1 }
  0xee   : > { %683 = vst [vmem:[%s1457_s12 + $0xd0] sm:$0xff] %v651_v37  ;;  %v649_v45 = vmax.f32 %v617_v38, 0.0  ;;  %v620_v46 = vadd.f32 %v1445_v20, %v581_v39  ;;  %v579_v47 = vmul.f32 %v1440_v18, %v519_v44  ;;  %v1123_v48 = vpop.f32.mrf.mxu0 }
  0xef   : > { %665 = vst [vmem:[%s1457_s12 + $0x40] sm:$0xff] %v633_v41  ;;  %v636_v49 = vmax.f32 %v604_v42, 0.0  ;;  %v602_v50 = vadd.f32 %v1445_v20, %v563_v43  ;;  %v568_v51 = vmul.f32 %v1123_v48, %v1440_v18  ;;  %v1139_v52 = vpop.f32.mrf.mxu1 }
  0xf0   : > { %681 = vst [vmem:[%s1457_s12 + $0xc0] sm:$0xff] %v649_v45  ;;  %v652_v53 = vmax.f32 %v620_v46, 0.0  ;;  %v618_v54 = vadd.f32 %v1445_v20, %v579_v47  ;;  %v584_v55 = vmul.f32 %v1139_v52, %v1440_v18  ;;  %v468_v56 = vpop.f32.mrf.mxu0 }
  0xf1   : > { %668 = vst [vmem:[%s1457_s12 + $0x58] sm:$0xff] %v636_v49  ;;  %v634_v57 = vmax.f32 %v602_v50, 0.0  ;;  %v607_v58 = vadd.f32 %v1445_v20, %v568_v51  ;;  %v566_v59 = vmul.f32 %v1440_v18, %v468_v56  ;;  %v532_v60 = vpop.f32.mrf.mxu1 }
  0xf2   : > { %684 = vst [vmem:[%s1457_s12 + $0xd8] sm:$0xff] %v652_v53  ;;  %v650_v61 = vmax.f32 %v618_v54, 0.0  ;;  %v623_v62 = vadd.f32 %v1445_v20, %v584_v55  ;;  %v582_v63 = vmul.f32 %v1440_v18, %v532_v60  ;;  %v1124_v0 = vpop.f32.mrf.mxu0 }
  0xf3   : > { %666 = vst [vmem:[%s1457_s12 + $0x48] sm:$0xff] %v634_v57  ;;  %v639_v1 = vmax.f32 %v607_v58, 0.0  ;;  %v605_v2 = vadd.f32 %v1445_v20, %v566_v59  ;;  %v569_v3 = vmul.f32 %v1124_v0, %v1440_v18  ;;  %v1140_v4 = vpop.f32.mrf.mxu1 }
  0xf4   : > { %682 = vst [vmem:[%s1457_s12 + $0xc8] sm:$0xff] %v650_v61  ;;  %v655_v5 = vmax.f32 %v623_v62, 0.0  ;;  %v621_v6 = vadd.f32 %v1445_v20, %v582_v63  ;;  %v585_v7 = vmul.f32 %v1140_v4, %v1440_v18  ;;  %v471_v8 = vpop.f32.mrf.mxu0 }
  0xf5   : > { %671 = vst [vmem:[%s1457_s12 + $0x70] sm:$0xff] %v639_v1  ;;  %v637_v9 = vmax.f32 %v605_v2, 0.0  ;;  %v608_v10 = vadd.f32 %v1445_v20, %v569_v3  ;;  %v567_v11 = vmul.f32 %v1440_v18, %v471_v8  ;;  %v535_v12 = vpop.f32.mrf.mxu1 }
  0xf6   : > { %687 = vst [vmem:[%s1457_s12 + $0xf0] sm:$0xff] %v655_v5  ;;  %v653_v13 = vmax.f32 %v621_v6, 0.0  ;;  %v624_v14 = vadd.f32 %v1445_v20, %v585_v7  ;;  %v583_v15 = vmul.f32 %v1440_v18, %v535_v12 }
  0xf7   : > { %669 = vst [vmem:[%s1457_s12 + $0x60] sm:$0xff] %v637_v9  ;;  %v640_v16 = vmax.f32 %v608_v10, 0.0  ;;  %v606_v17 = vadd.f32 %v1445_v20, %v567_v11 }
  0xf8   : > { %685 = vst [vmem:[%s1457_s12 + $0xe0] sm:$0xff] %v653_v13  ;;  %v656_v19 = vmax.f32 %v624_v14, 0.0  ;;  %v622_v21 = vadd.f32 %v1445_v20, %v583_v15  ;;  %695 = sbr.rel (!%p1387_p4) target bundleno = 301 (0x12d), region = 40 }
  0xf9   : > { %672 = vst [vmem:[%s1457_s12 + $0x78] sm:$0xff] %v640_v16  ;;  %v638_v22 = vmax.f32 %v606_v17, 0.0 }
  0xfa   : > { %688 = vst [vmem:[%s1457_s12 + $0xf8] sm:$0xff] %v656_v19  ;;  %v654_v23 = vmax.f32 %v622_v21, 0.0 }
  0xfb   : > { %670 = vst [vmem:[%s1457_s12 + $0x68] sm:$0xff] %v638_v22 }
  0xfc   : > { %686 = vst [vmem:[%s1457_s12 + $0xe8] sm:$0xff] %v654_v23 }
  0xfd   : > { %s1699_s13 = smov (!%p698_p8, %s697_s13), 32 }
  0xfe   : > { %s1072_s21 = sshll.u32 %s1699_s13, 7 }
  0xff   : > { %p1075_p9 = scmp.eq.s32.totalorder %s1072_s21, 0 }
 0x100   : > { %s1558_s24 = sshrl.u32 (!%p1075_p9), %s1699_s13, 5 }
 0x101   : > { %706 = sbr.rel (%p1075_p9) target bundleno = 301 (0x12d), region = 44  ;;  %p1076_p10 = scmp.le.s32.totalorder (!%p1075_p9), %s1558_s24, 0 }
 0x106   : > { %985 = sbr.rel (%p1076_p10) target bundleno = 284 (0x11c), region = 120  ;;  %s1690_s18 = smov (!%p1076_p10), %s1552_s20 }
 0x107   : > { %s1691_s23 = smov (!%p1076_p10), %s1457_s12  ;;  %s1567_s25 = smov (!%p1076_p10), 0  }
 0x108   : > { %s1569_s26 = smov (!%p1076_p10), 0  }
 0x10b LB: >> { %v831_v18 = vld [vmem:[%s1311_s23] sm:$0xff]  ;;  %v833_v20 = vld [vmem:[%s1311_s23 + $0x8] sm:$0xff]  ;;  %v835_v24 = vld [vmem:[%s1311_s23 + $0x10] sm:$0xff]  ;;  %s895_s27 = sadd.s32 1, %s1315_s25  ;;  %s825_s26 = sadd.s32 1, %s1319_s26   ;;  %s1319_s26 = sphi %s1569_s26, %s825_s26   ;;  %s1315_s25 = sphi %s1567_s25, %s1694_s25   ;;  %s1311_s23 = sphi %s1691_s23, %s1693_s23   ;;  %s1307_s18 = sphi %s1690_s18, %s1692_s18  }
 0x10c   : >> { %832 = vst [vmem:[%s1307_s18] sm:$0xff] %v831_v18  ;;  %834 = vst [vmem:[%s1307_s18 + $0x8] sm:$0xff] %v833_v20  ;;  %v837_v25 = vld [vmem:[%s1311_s23 + $0x18] sm:$0xff]  ;;  %v839_v26 = vld [vmem:[%s1311_s23 + $0x20] sm:$0xff]  ;;  %p896_p11 = scmp.ge.s32.totalorder %s895_s27, %s1558_s24  ;;  %p824_p12 = scmp.ge.s32.totalorder %s825_s26, %s1558_s24 }
 0x10d   : >> { %836 = vst [vmem:[%s1307_s18 + $0x10] sm:$0xff] %v835_v24  ;;  %v841_v27 = vld [vmem:[%s1311_s23 + $0x28] sm:$0xff]  ;;  %838 = vst [vmem:[%s1307_s18 + $0x18] sm:$0xff] %v837_v25  ;;  %v843_v28 = vld [vmem:[%s1311_s23 + $0x30] sm:$0xff] }
 0x10e   : >> { %840 = vst [vmem:[%s1307_s18 + $0x20] sm:$0xff] %v839_v26  ;;  %842 = vst [vmem:[%s1307_s18 + $0x28] sm:$0xff] %v841_v27  ;;  %v845_v29 = vld [vmem:[%s1311_s23 + $0x38] sm:$0xff]  ;;  %v847_v30 = vld [vmem:[%s1311_s23 + $0x40] sm:$0xff]  ;;  %s1701_s27 = smov (%p896_p11, %s895_s27), 0 }
 0x10f   : >> { %844 = vst [vmem:[%s1307_s18 + $0x30] sm:$0xff] %v843_v28  ;;  %846 = vst [vmem:[%s1307_s18 + $0x38] sm:$0xff] %v845_v29  ;;  %v849_v31 = vld [vmem:[%s1311_s23 + $0x48] sm:$0xff]  ;;  %v851_v32 = vld [vmem:[%s1311_s23 + $0x50] sm:$0xff]  ;;  %s1077_s28 = sshll.u32 %s1701_s27, 8  ;;  %s1694_s25 = smov %s1701_s27 }
 0x110   : >> { %848 = vst [vmem:[%s1307_s18 + $0x40] sm:$0xff] %v847_v30  ;;  %v853_v33 = vld [vmem:[%s1311_s23 + $0x58] sm:$0xff]  ;;  %850 = vst [vmem:[%s1307_s18 + $0x48] sm:$0xff] %v849_v31  ;;  %v855_v34 = vld [vmem:[%s1311_s23 + $0x60] sm:$0xff]  ;;  %s1625_s29 = scalar_lea.vmem %s1457_s12, %s1077_s28 [#allocation2]   ;;  %s901_s30 = scalar_lea.vmem %s1552_s20, %s1077_s28  }
 0x111   : >> { %852 = vst [vmem:[%s1307_s18 + $0x50] sm:$0xff] %v851_v32  ;;  %854 = vst [vmem:[%s1307_s18 + $0x58] sm:$0xff] %v853_v33  ;;  %v857_v35 = vld [vmem:[%s1311_s23 + $0x68] sm:$0xff]  ;;  %v859_v36 = vld [vmem:[%s1311_s23 + $0x70] sm:$0xff] }
 0x112   : >> { %856 = vst [vmem:[%s1307_s18 + $0x60] sm:$0xff] %v855_v34  ;;  %858 = vst [vmem:[%s1307_s18 + $0x68] sm:$0xff] %v857_v35  ;;  %v861_v37 = vld [vmem:[%s1311_s23 + $0x78] sm:$0xff]  ;;  %v863_v38 = vld [vmem:[%s1311_s23 + $0x80] sm:$0xff] }
 0x113   : >> { %860 = vst [vmem:[%s1307_s18 + $0x70] sm:$0xff] %v859_v36  ;;  %v865_v39 = vld [vmem:[%s1311_s23 + $0x88] sm:$0xff]  ;;  %862 = vst [vmem:[%s1307_s18 + $0x78] sm:$0xff] %v861_v37  ;;  %v867_v40 = vld [vmem:[%s1311_s23 + $0x90] sm:$0xff] }
 0x114   : >> { %864 = vst [vmem:[%s1307_s18 + $0x80] sm:$0xff] %v863_v38  ;;  %866 = vst [vmem:[%s1307_s18 + $0x88] sm:$0xff] %v865_v39  ;;  %v869_v41 = vld [vmem:[%s1311_s23 + $0x98] sm:$0xff]  ;;  %v871_v42 = vld [vmem:[%s1311_s23 + $0xa0] sm:$0xff] }
 0x115   : >> { %868 = vst [vmem:[%s1307_s18 + $0x90] sm:$0xff] %v867_v40  ;;  %870 = vst [vmem:[%s1307_s18 + $0x98] sm:$0xff] %v869_v41  ;;  %v873_v43 = vld [vmem:[%s1311_s23 + $0xa8] sm:$0xff]  ;;  %v875_v44 = vld [vmem:[%s1311_s23 + $0xb0] sm:$0xff] }
 0x116   : >> { %872 = vst [vmem:[%s1307_s18 + $0xa0] sm:$0xff] %v871_v42  ;;  %v877_v45 = vld [vmem:[%s1311_s23 + $0xb8] sm:$0xff]  ;;  %874 = vst [vmem:[%s1307_s18 + $0xa8] sm:$0xff] %v873_v43  ;;  %v879_v46 = vld [vmem:[%s1311_s23 + $0xc0] sm:$0xff] }
 0x117   : >> { %876 = vst [vmem:[%s1307_s18 + $0xb0] sm:$0xff] %v875_v44  ;;  %878 = vst [vmem:[%s1307_s18 + $0xb8] sm:$0xff] %v877_v45  ;;  %v881_v47 = vld [vmem:[%s1311_s23 + $0xc8] sm:$0xff]  ;;  %v883_v48 = vld [vmem:[%s1311_s23 + $0xd0] sm:$0xff]  ;;  %827 = sbr.rel (!%p824_p12) target bundleno = 267 (0x10b), region = 126 }
 0x118   : >> { %880 = vst [vmem:[%s1307_s18 + $0xc0] sm:$0xff] %v879_v46  ;;  %882 = vst [vmem:[%s1307_s18 + $0xc8] sm:$0xff] %v881_v47  ;;  %v885_v49 = vld [vmem:[%s1311_s23 + $0xd8] sm:$0xff]  ;;  %v887_v50 = vld [vmem:[%s1311_s23 + $0xe0] sm:$0xff] }
 0x119   : >> { %884 = vst [vmem:[%s1307_s18 + $0xd0] sm:$0xff] %v883_v48  ;;  %v889_v51 = vld [vmem:[%s1311_s23 + $0xe8] sm:$0xff]  ;;  %886 = vst [vmem:[%s1307_s18 + $0xd8] sm:$0xff] %v885_v49  ;;  %v891_v52 = vld [vmem:[%s1311_s23 + $0xf0] sm:$0xff] }
 0x11a   : >> { %888 = vst [vmem:[%s1307_s18 + $0xe0] sm:$0xff] %v887_v50  ;;  %890 = vst [vmem:[%s1307_s18 + $0xe8] sm:$0xff] %v889_v51  ;;  %v893_v53 = vld [vmem:[%s1311_s23 + $0xf8] sm:$0xff]  ;;  %s1693_s23 = smov %s1625_s29 }
 0x11b   : >> { %892 = vst [vmem:[%s1307_s18 + $0xf0] sm:$0xff] %v891_v52  ;;  %894 = vst [vmem:[%s1307_s18 + $0xf8] sm:$0xff] %v893_v53  ;;  %s1692_s18 = smov %s901_s30 }
 0x11c PF: > { %s1666_s5 = sand.u32 31, %s1699_s13   ;;  %s1088_s6 = sshll.u32 %s1558_s24, 8 }
 0x11d   : > { %s906_s7 = scalar_lea.vmem %s1457_s12, %s1088_s6 [#allocation2]   ;;  %s908_s8 = scalar_lea.vmem %s1552_s20, %s1088_s6  }
 0x11e   : > { %p1082_p13 = scmp.le.s32.totalorder %s1666_s5, 0 }
 0x11f   : > { %s1321_s9 = smov (!%p1082_p13), %s908_s8   ;;  %s1325_s10 = smov (!%p1082_p13), %s906_s7  }
 0x120   : > { %999 = sbr.rel (%p1082_p13) target bundleno = 301 (0x12d), region = 131  ;;  %s1329_s11 = smov (!%p1082_p13), 0  }
 0x121   : > { %s1333_s14 = smov (!%p1082_p13), 0  }
 0x125 LB: >> { %v918_v54 = vld [vmem:[%s1327_s10] sm:$0xff]  ;;  %s920_s13 = sadd.s32 1, %s1331_s11  ;;  %s912_s14 = sadd.s32 1, %s1335_s14   ;;  %s1335_s14 = sphi %s1333_s14, %s912_s14   ;;  %s1331_s11 = sphi %s1329_s11, %s1330_s11   ;;  %s1327_s10 = sphi %s1325_s10, %s925_s10   ;;  %s1323_s9 = sphi %s1321_s9, %s926_s9  }
 0x126   : >> { %919 = vst [vmem:[%s1323_s9] sm:$0xff] %v918_v54  ;;  %p921_p0 = scmp.ge.s32.totalorder %s920_s13, %s1666_s5  ;;  %p911_p1 = scmp.ge.s32.totalorder %s912_s14, %s1666_s5 }
 0x128   : >> { %s1703_s13 = smov (%p921_p0, %s920_s13), 0  ;;  %914 = sbr.rel (!%p911_p1) target bundleno = 293 (0x125), region = 137 }
 0x129   : >> { %s1083_s12 = sshll.u32 %s1703_s13, 3  ;;  %s1330_s11 = smov %s1703_s13  }
 0x12a   : >> { %s925_s10 = scalar_lea.vmem %s906_s7, %s1083_s12 [#allocation2]   ;;  %s926_s9 = scalar_lea.vmem %s908_s8, %s1083_s12  }
 0x12d PF: > { %p11_p2 = scmp.ge.s32.totalorder %s1377_s19, 4   ;;  %s1695_s15 = smov %s1299_s16 }
 0x12e   : > { %s1696_s16 = smov %s1385_s22  ;;  %s1697_s17 = smov %s1377_s19 }
 0x12f   :  { %13 = sbr.rel (!%p11_p2) target bundleno = 2 (0x2), region = 148 }

// kernel: reverse.1
= control target key start
LH: loop header
LB: loop body
LE: loop exit
PB: predicated region body
PF: predicated region fallthrough
CT: control target
= control target key end

     0   :  { %v2_v0 = vlaneseq  ;;  %s240_s0 = inlined_call_operand.vmem [shape: f32[2,8,4,3], index: 0, kind: input, shape index: {}]   ;;  %s241_s1 = inlined_call_operand.vmem [shape: f32[2,8,4,3], index: 1, kind: output, shape index: {}]  }
   0x1   :  { %v51_v2 = vld [vmem:[%s240_s0 + $0x10] sm:$0xff]  ;;  %v47_v3 = vld [vmem:[%s240_s0] sm:$0xff]  ;;  %v53_v4 = vld [vmem:[%s240_s0 + $0x18] sm:$0xff] }
   0x2   :  { %v3_v1 = vsub.s32 2, %v2_v0  ;;  %v49_v5 = vld [vmem:[%s240_s0 + $0x8] sm:$0xff]  ;;  %v55_v7 = vld [vmem:[%s240_s0 + $0x20] sm:$0xff]  ;;  %v61_v8 = vld [vmem:[%s240_s0 + $0x38] sm:$0xff] }
   0x3   :  { %v57_v6 = vld [vmem:[%s240_s0 + $0x28] sm:$0xff]  ;;  %v59_v9 = vld [vmem:[%s240_s0 + $0x30] sm:$0xff] }
   0x4   :  { %4 = vset.pattern.permute.xlu0 %v3_v1  ;;  %181 = vset.pattern.permute.xlu1 %v3_v1 }
   0x5   :  { %79 = vperm.xlu1 %181, %v51_v2   ;;  %67 = vperm.xlu0 %4, %v47_v3  }
   0x9   :  { %85 = vperm.xlu1 %181, %v53_v4   ;;  %73 = vperm.xlu0 %4, %v49_v5  }
   0xd   :  { %97 = vperm.xlu1 %181, %v57_v6   ;;  %91 = vperm.xlu0 %4, %v55_v7  }
  0x11   :  { %109 = vperm.xlu1 %181, %v61_v8   ;;  %103 = vperm.xlu0 %4, %v59_v9  }
  0x80   :  { %v80_v10 = vpop.permute.xlu1 %79  ;;  %v68_v11 = vpop.permute.xlu0 %67 }
  0x81   :  { %159 = vst [vmem:[%s241_s1 + $0x10] sm:$0xff] %v80_v10  ;;  %155 = vst [vmem:[%s241_s1] sm:$0xff] %v68_v11 }
  0x84   :  { %v86_v12 = vpop.permute.xlu1 %85  ;;  %v74_v13 = vpop.permute.xlu0 %73 }
  0x85   :  { %161 = vst [vmem:[%s241_s1 + $0x18] sm:$0xff] %v86_v12  ;;  %157 = vst [vmem:[%s241_s1 + $0x8] sm:$0xff] %v74_v13 }
  0x88   :  { %v98_v14 = vpop.permute.xlu1 %97  ;;  %v92_v15 = vpop.permute.xlu0 %91 }
  0x89   :  { %165 = vst [vmem:[%s241_s1 + $0x28] sm:$0xff] %v98_v14  ;;  %163 = vst [vmem:[%s241_s1 + $0x20] sm:$0xff] %v92_v15 }
  0x8c   :  { %v110_v16 = vpop.permute.xlu1 %109  ;;  %v104_v17 = vpop.permute.xlu0 %103 }
  0x8d   :  { %169 = vst [vmem:[%s241_s1 + $0x38] sm:$0xff] %v110_v16  ;;  %167 = vst [vmem:[%s241_s1 + $0x30] sm:$0xff] %v104_v17 }

// kernel: ffc_forward.6
= control target key start
LH: loop header
LB: loop body
LE: loop exit
PB: predicated region body
PF: predicated region fallthrough
CT: control target
= control target key end

     0   :  { %vm70_vm0 = vcmask 1043456   ;;  %v254_v0 = vmov 0.0   ;;  %vm255_vm1 = vmmov 0   ;;  %vm54_vm2 = vcmask 64512   ;;  %s340_s1 = inlined_call_operand.vmem [shape: bf16[8,128], index: 1, kind: input, shape index: {}]   ;;  %s341_s0 = inlined_call_operand.vmem [shape: bf16[80,8], index: 0, kind: input, shape index: {}]   ;;  %s342_s2 = inlined_call_operand.vmem [shape: f32[1,128], index: 2, kind: input, shape index: {}]   ;;  %s343_s3 = inlined_call_operand.vmem [shape: f32[1,128], index: 3, kind: input, shape index: {}]   ;;  %s344_s4 = inlined_call_operand.vmem [shape: f32[80,128], index: 4, kind: output, shape index: {}]  }
   0x1   :  { %223 = vmatprep.subr.bf16.mxu0 %v254_v0  ;;  %v28_v1 = vld [vmem:[%s340_s1] sm:$0xf]  ;;  %245 = vmatprep.subr.bf16.mxu1 %v254_v0  ;;  %v250_v4 = vld [vmem:[%s341_s0 + $0x18] sm:$0xff]   ;;  %v251_v5 = vld [vmem:[%s341_s0 + $0x8] sm:$0xff]  }
   0x2   :  { %v72_v2 = vsel %vm70_vm0, %v28_v1, 0  ;;  %225 = vmatprep.mubr.msk.bf16.mxu0 %vm255_vm1, %v254_v0  ;;  %v249_v3 = vld [vmem:[%s341_s0] sm:$0xff]   ;;  %237 = vmatprep.mubr.msk.bf16.mxu1 %vm255_vm1, %v254_v0  ;;  %v253_v7 = vld [vmem:[%s341_s0 + $0x10] sm:$0xff]  }
   0x3   :  { %224 = vmatpush3.bf16.msra.mxu0 %v72_v2  ;;  %246 = vmatpush3.bf16.msra.mxu1 %v72_v2  ;;  %v252_v6 = vld [vmem:[%s341_s0 + $0x20] sm:$0xff]  }
   0x4   :  { %v215_v8 = vld [vmem:[%s342_s2] ss:$0 sm:$0xff] }
   0x5   :  { %v216_v10 = vld [vmem:[%s343_s3] ss:$0 sm:$0xff] }
   0x6   :  { %226 = vmatmul.mubr.msk.bf16.vlgmr.msra.gmra.mxu0 %vm54_vm2, %v249_v3  ;;  %238 = vmatmul.mubr.msk.bf16.vlgmr.msra.gmra.mxu1 %vm54_vm2, %v250_v4 }
   0x7   :  { %229 = vmatprep.mubr.msk.bf16.mxu0 %vm255_vm1, %v254_v0  ;;  %241 = vmatprep.mubr.msk.bf16.mxu1 %vm255_vm1, %v254_v0 }
   0xe   :  { %230 = vmatmul.mubr.msk.bf16.gmra.mxu0 %vm54_vm2, %v251_v5  ;;  %242 = vmatmul.mubr.msk.bf16.gmra.mxu1 %vm54_vm2, %v252_v6 }
   0xf   :  { %233 = vmatprep.mubr.msk.bf16.mxu0 %vm255_vm1, %v254_v0 }
  0x16   :  { %234 = vmatmul.mubr.msk.bf16.gmra.mxu0 %vm54_vm2, %v253_v7 }
  0xc6   :  { %v108_v9 = vpop.f32.mrf.mxu0  ;;  %v132_v11 = vpop.f32.mrf.mxu1 }
  0xc7   :  { %v154_v12 = vmul.f32 %v215_v8, %v108_v9  ;;  %v160_v13 = vmul.f32 %v215_v8, %v132_v11 }
  0xc8   :  { %v227_v14 = vpop.f32.mrf.mxu0  ;;  %v239_v15 = vpop.f32.mrf.mxu1 }
  0xc9   :  { %v171_v16 = vadd.f32 %v216_v10, %v154_v12  ;;  %v177_v17 = vadd.f32 %v216_v10, %v160_v13 }
  0xca   :  { %v111_v18 = vpop.f32.mrf.mxu0  ;;  %v135_v19 = vpop.f32.mrf.mxu1 }
  0xcb   :  { %v181_v20 = vmax.f32 %v171_v16, 0.0  ;;  %v187_v21 = vmax.f32 %v177_v17, 0.0  ;;  %v155_v22 = vmul.f32 %v215_v8, %v111_v18  ;;  %v161_v23 = vmul.f32 %v215_v8, %v135_v19 }
  0xcc   :  { %v228_v24 = vpop.f32.mrf.mxu0  ;;  %v240_v25 = vpop.f32.mrf.mxu1 }
  0xcd   :  { %191 = vst [vmem:[%s344_s4] sm:$0xff] %v181_v20  ;;  %197 = vst [vmem:[%s344_s4 + $0x30] sm:$0xff] %v187_v21  ;;  %v172_v26 = vadd.f32 %v216_v10, %v155_v22  ;;  %v178_v27 = vadd.f32 %v216_v10, %v161_v23 }
  0xce   :  { %v116_v28 = vpop.f32.mrf.mxu0  ;;  %v140_v29 = vpop.f32.mrf.mxu1 }
  0xcf   :  { %v182_v30 = vmax.f32 %v172_v26, 0.0  ;;  %v188_v31 = vmax.f32 %v178_v27, 0.0  ;;  %v156_v32 = vmul.f32 %v215_v8, %v116_v28  ;;  %v162_v33 = vmul.f32 %v215_v8, %v140_v29 }
  0xd0   :  { %v231_v34 = vpop.f32.mrf.mxu0  ;;  %v243_v35 = vpop.f32.mrf.mxu1 }
  0xd1   :  { %192 = vst [vmem:[%s344_s4 + $0x8] sm:$0xff] %v182_v30  ;;  %198 = vst [vmem:[%s344_s4 + $0x38] sm:$0xff] %v188_v31  ;;  %v173_v36 = vadd.f32 %v216_v10, %v156_v32  ;;  %v179_v37 = vadd.f32 %v216_v10, %v162_v33 }
  0xd2   :  { %v119_v38 = vpop.f32.mrf.mxu0  ;;  %v143_v39 = vpop.f32.mrf.mxu1 }
  0xd3   :  { %v183_v40 = vmax.f32 %v173_v36, 0.0  ;;  %v189_v41 = vmax.f32 %v179_v37, 0.0  ;;  %v157_v42 = vmul.f32 %v215_v8, %v119_v38  ;;  %v163_v43 = vmul.f32 %v215_v8, %v143_v39 }
  0xd4   :  { %v232_v44 = vpop.f32.mrf.mxu0  ;;  %v244_v45 = vpop.f32.mrf.mxu1 }
  0xd5   :  { %193 = vst [vmem:[%s344_s4 + $0x10] sm:$0xff] %v183_v40  ;;  %199 = vst [vmem:[%s344_s4 + $0x40] sm:$0xff] %v189_v41  ;;  %v174_v46 = vadd.f32 %v216_v10, %v157_v42  ;;  %v180_v47 = vadd.f32 %v216_v10, %v163_v43 }
  0xd6   :  { %v124_v48 = vpop.f32.mrf.mxu0 }
  0xd7   :  { %v184_v49 = vmax.f32 %v174_v46, 0.0  ;;  %v190_v50 = vmax.f32 %v180_v47, 0.0  ;;  %v158_v51 = vmul.f32 %v215_v8, %v124_v48 }
  0xd8   :  { %v235_v52 = vpop.f32.mrf.mxu0 }
  0xd9   :  { %194 = vst [vmem:[%s344_s4 + $0x18] sm:$0xff] %v184_v49  ;;  %200 = vst [vmem:[%s344_s4 + $0x48] sm:$0xff] %v190_v50  ;;  %v175_v53 = vadd.f32 %v216_v10, %v158_v51 }
  0xda   :  { %v127_v54 = vpop.f32.mrf.mxu0 }
  0xdb   :  { %v185_v55 = vmax.f32 %v175_v53, 0.0  ;;  %v159_v56 = vmul.f32 %v215_v8, %v127_v54 }
  0xdc   :  { %v236_v57 = vpop.f32.mrf.mxu0 }
  0xdd   :  { %195 = vst [vmem:[%s344_s4 + $0x20] sm:$0xff] %v185_v55  ;;  %v176_v58 = vadd.f32 %v216_v10, %v159_v56 }
  0xdf   :  { %v186_v59 = vmax.f32 %v176_v58, 0.0 }
  0xe1   :  { %196 = vst [vmem:[%s344_s4 + $0x28] sm:$0xff] %v186_v59 }

// kernel: ffc_forward.7
= control target key start
LH: loop header
LB: loop body
LE: loop exit
PB: predicated region body
PF: predicated region fallthrough
CT: control target
= control target key end

     0   :  { %s1377_s15 = smov 0   ;;  %s1801_s0 = inlined_call_operand.vmem [shape: f32[512,128], index: 0, kind: input, shape index: {}]   ;;  %s1802_s1 = inlined_call_operand.vmem [shape: f32[512,4], index: 1, kind: input, shape index: {}]   ;;  %s1803_s2 = inlined_call_operand.vmem [shape: f32[512,4], index: 2, kind: input, shape index: {}]   ;;  %s1804_s3 = inlined_call_operand.vmem [shape: bf16[8,128], index: 3, kind: input, shape index: {}]   ;;  %s1805_s4 = inlined_call_operand.vmem [shape: f32[512,128], index: 4, kind: output, shape index: {}]  }
   0x1 LB: > { %s1166_s16 = sadd.s32 4294967295, %s1348_s15   ;;  %p1170_p0 = scmp.ge.s32.totalorder %s1348_s15, 1  ;;  %s1348_s15 = sphi %s1377_s15, %s14_s15  }
   0x2   : > { %p185_p1 = scmp.lt.s32.totalorder %s1348_s15, 3 }
   0x4   : > { %p186_p2 = pnand %p1170_p0, %p185_p1 }
   0x5   : > { %s1171_s17 = sshll.u32 (!%p186_p2), %s1166_s16, 5  ;;  %s1350_s22 = smov (!%p186_p2), 8  }
   0x6   : > { %189 = sbr.rel (%p186_p2) target bundleno = 579 (0x243), region = 36  ;;  %p222_p3 = scmp.lt.s32.totalorder (!%p186_p2), %s1171_s17, 63 }
   0x7   : > { %s1351_s5 = smov (!%p186_p2), 120  }
   0xb   : > { %s1807_s17 = smov (!%p222_p3, %s1171_s17), 63  ;;  %vm889_vm0 = vcmask 1043456   ;;  %vm790_vm1 = vcmask 31744   ;;  %vm840_vm2 = vcmask 64512  }
   0xc   : > { %s1385_s18 = sshll.u32 %s1807_s17, 3 }
   0xd   : > { %s1391_s21 = scalar_lea.vmem %s1802_s1, %s1385_s18  ;;  %s1411_s25 = scalar_lea.vmem %s1803_s2, %s1385_s18 }
   0xe   : > { %v294_v0 = vld [vmem:[%s1391_s21 + $0x80] sm:$0xff]  ;;  %v295_v2 = vld [vmem:[%s1391_s21 + $0x88] sm:$0xff]  ;;  %v281_v4 = vld [vmem:[%s1391_s21 + $0x18] sm:$0xff]  ;;  %s1529_s28 = scalar_lea.vmem %s1801_s0, %s1385_s18  ;;  %s1764_s8 = scalar_lea.vmem %s1805_s4, %s1385_s18 }
   0xf   : > { %v278_v1 = vld [vmem:[%s1391_s21] sm:$0xff]  ;;  %374 = vrot.lane.b32.xlu1 %v294_v0, %s1350_s22  ;;  %v279_v3 = vld [vmem:[%s1391_s21 + $0x8] sm:$0xff]  ;;  %v280_v5 = vld [vmem:[%s1391_s21 + $0x10] sm:$0xff] }
  0x10   : > { %342 = vrot.lane.b32.xlu0 %v278_v1, %s1350_s22  ;;  %v297_v6 = vld [vmem:[%s1391_s21 + $0x98] sm:$0xff]  ;;  %v296_v7 = vld [vmem:[%s1391_s21 + $0x90] sm:$0xff]  ;;  %v471_v8 = vld [vmem:[%s1411_s25 + $0x8] sm:$0xff] }
  0x11   : > { %v470_v9 = vld [vmem:[%s1411_s25] sm:$0xff]  ;;  %v487_v10 = vld [vmem:[%s1411_s25 + $0x88] sm:$0xff]  ;;  %v473_v12 = vld [vmem:[%s1411_s25 + $0x18] sm:$0xff] }
  0x12   : > { %v486_v11 = vld [vmem:[%s1411_s25 + $0x80] sm:$0xff]  ;;  %v472_v13 = vld [vmem:[%s1411_s25 + $0x10] sm:$0xff]  ;;  %v489_v14 = vld [vmem:[%s1411_s25 + $0x98] sm:$0xff] }
  0x13   : > { %376 = vrot.lane.b32.xlu1 %v295_v2, %s1350_s22  ;;  %v488_v15 = vld [vmem:[%s1411_s25 + $0x90] sm:$0xff]  ;;  %v283_v16 = vld [vmem:[%s1391_s21 + $0x28] sm:$0xff]  ;;  %v282_v17 = vld [vmem:[%s1391_s21 + $0x20] sm:$0xff] }
  0x14   : > { %344 = vrot.lane.b32.xlu0 %v279_v3, %s1350_s22  ;;  %v299_v18 = vld [vmem:[%s1391_s21 + $0xa8] sm:$0xff]  ;;  %v298_v19 = vld [vmem:[%s1391_s21 + $0xa0] sm:$0xff]  ;;  %v285_v20 = vld [vmem:[%s1391_s21 + $0x38] sm:$0xff] }
  0x15   : > { %v284_v21 = vld [vmem:[%s1391_s21 + $0x30] sm:$0xff]  ;;  %v301_v22 = vld [vmem:[%s1391_s21 + $0xb8] sm:$0xff]  ;;  %v475_v24 = vld [vmem:[%s1411_s25 + $0x28] sm:$0xff] }
  0x16   : > { %v300_v23 = vld [vmem:[%s1391_s21 + $0xb0] sm:$0xff]  ;;  %v474_v25 = vld [vmem:[%s1411_s25 + $0x20] sm:$0xff]  ;;  %v491_v26 = vld [vmem:[%s1411_s25 + $0xa8] sm:$0xff] }
  0x17   : > { %348 = vrot.lane.b32.xlu1 %v281_v4, %s1350_s22  ;;  %v490_v27 = vld [vmem:[%s1411_s25 + $0xa0] sm:$0xff]  ;;  %v477_v28 = vld [vmem:[%s1411_s25 + $0x38] sm:$0xff]  ;;  %v476_v29 = vld [vmem:[%s1411_s25 + $0x30] sm:$0xff] }
  0x18   : > { %346 = vrot.lane.b32.xlu0 %v280_v5, %s1350_s22  ;;  %v493_v30 = vld [vmem:[%s1411_s25 + $0xb8] sm:$0xff]  ;;  %v492_v31 = vld [vmem:[%s1411_s25 + $0xb0] sm:$0xff]  ;;  %v287_v32 = vld [vmem:[%s1391_s21 + $0x48] sm:$0xff] }
  0x19   : > { %v286_v33 = vld [vmem:[%s1391_s21 + $0x40] sm:$0xff]  ;;  %v303_v34 = vld [vmem:[%s1391_s21 + $0xc8] sm:$0xff]  ;;  %v289_v36 = vld [vmem:[%s1391_s21 + $0x58] sm:$0xff] }
  0x1a   : > { %v302_v35 = vld [vmem:[%s1391_s21 + $0xc0] sm:$0xff]  ;;  %v288_v37 = vld [vmem:[%s1391_s21 + $0x50] sm:$0xff]  ;;  %v305_v38 = vld [vmem:[%s1391_s21 + $0xd8] sm:$0xff] }
  0x1b   : > { %380 = vrot.lane.b32.xlu1 %v297_v6, %s1350_s22  ;;  %v304_v39 = vld [vmem:[%s1391_s21 + $0xd0] sm:$0xff]  ;;  %v479_v40 = vld [vmem:[%s1411_s25 + $0x48] sm:$0xff]  ;;  %v478_v41 = vld [vmem:[%s1411_s25 + $0x40] sm:$0xff] }
  0x1c   : > { %378 = vrot.lane.b32.xlu0 %v296_v7, %s1350_s22  ;;  %v495_v42 = vld [vmem:[%s1411_s25 + $0xc8] sm:$0xff]  ;;  %v494_v43 = vld [vmem:[%s1411_s25 + $0xc0] sm:$0xff]  ;;  %v481_v44 = vld [vmem:[%s1411_s25 + $0x58] sm:$0xff] }
  0x1d   : > { %v480_v45 = vld [vmem:[%s1411_s25 + $0x50] sm:$0xff]  ;;  %v497_v46 = vld [vmem:[%s1411_s25 + $0xd8] sm:$0xff]  ;;  %v291_v48 = vld [vmem:[%s1391_s21 + $0x68] sm:$0xff] }
  0x1e   : > { %v496_v47 = vld [vmem:[%s1411_s25 + $0xd0] sm:$0xff]  ;;  %v290_v49 = vld [vmem:[%s1391_s21 + $0x60] sm:$0xff]  ;;  %v307_v50 = vld [vmem:[%s1391_s21 + $0xe8] sm:$0xff] }
  0x1f   : > { %536 = vrot.lane.b32.xlu1 %v471_v8, %s1350_s22  ;;  %v306_v51 = vld [vmem:[%s1391_s21 + $0xe0] sm:$0xff]  ;;  %v293_v52 = vld [vmem:[%s1391_s21 + $0x78] sm:$0xff]  ;;  %v292_v53 = vld [vmem:[%s1391_s21 + $0x70] sm:$0xff] }
  0x20   : > { %534 = vrot.lane.b32.xlu0 %v470_v9, %s1350_s22  ;;  %v309_v54 = vld [vmem:[%s1391_s21 + $0xf8] sm:$0xff]  ;;  %v308_v55 = vld [vmem:[%s1391_s21 + $0xf0] sm:$0xff]  ;;  %v483_v56 = vld [vmem:[%s1411_s25 + $0x68] sm:$0xff] }
  0x21   : > { %v482_v57 = vld [vmem:[%s1411_s25 + $0x60] sm:$0xff]  ;;  %v499_v58 = vld [vmem:[%s1411_s25 + $0xe8] sm:$0xff]  ;;  %v485_v62 = vld [vmem:[%s1411_s25 + $0x78] sm:$0xff] }
  0x22   : > { %v498_v59 = vld [vmem:[%s1411_s25 + $0xe0] sm:$0xff]  ;;  %v484_v63 = vld [vmem:[%s1411_s25 + $0x70] sm:$0xff]  ;;  %v501_v2 = vld [vmem:[%s1411_s25 + $0xf8] sm:$0xff] }
  0x23   : > { %568 = vrot.lane.b32.xlu1 %v487_v10, %s1350_s22  ;;  %v500_v3 = vld [vmem:[%s1411_s25 + $0xf0] sm:$0xff]  ;;  %v1534_v6 = vld [vmem:[%s1529_s28] sm:$0xff]  ;;  %v1537_v7 = vld [vmem:[%s1529_s28 + $0x8] sm:$0xff] }
  0x24   : > { %566 = vrot.lane.b32.xlu0 %v486_v11, %s1350_s22 }
  0x27   : > { %540 = vrot.lane.b32.xlu1 %v473_v12, %s1350_s22  ;;  %v1542_v12 = vld [vmem:[%s1529_s28 + $0x80] sm:$0xff] }
  0x28   : > { %538 = vrot.lane.b32.xlu0 %v472_v13, %s1350_s22  ;;  %v1545_v13 = vld [vmem:[%s1529_s28 + $0x88] sm:$0xff] }
  0x2b   : > { %572 = vrot.lane.b32.xlu1 %v489_v14, %s1350_s22 }
  0x2c   : > { %570 = vrot.lane.b32.xlu0 %v488_v15, %s1350_s22 }
  0x2f   : > { %352 = vrot.lane.b32.xlu1 %v283_v16, %s1350_s22  ;;  %v839_v16 = vld [vmem:[%s1804_s3] sm:$0xf] }
  0x30   : > { %350 = vrot.lane.b32.xlu0 %v282_v17, %s1350_s22  ;;  %1250 = vmatprep.subr.msk.bf16.mxu0 %vm889_vm0, %v839_v16 }
  0x31   : > { %1251 = vmatprep.subr.msk.bf16.mxu1 %vm889_vm0, %v839_v16 }
  0x33   : > { %384 = vrot.lane.b32.xlu1 %v299_v18, %s1350_s22 }
  0x34   : > { %382 = vrot.lane.b32.xlu0 %v298_v19, %s1350_s22  ;;  %v891_v19 = vsel %vm889_vm0, %v839_v16, 0  ;;  %v1598_v16 = vld [vmem:[%s1529_s28 + $0xb8] sm:$0xff] }
  0x35   : > { %1215 = vmatpush3.bf16.msra.mxu0 %v891_v19  ;;  %1249 = vmatpush3.bf16.msra.mxu1 %v891_v19 }
  0x37   : > { %356 = vrot.lane.b32.xlu1 %v285_v20, %s1350_s22 }
  0x38   : > { %354 = vrot.lane.b32.xlu0 %v284_v21, %s1350_s22 }
  0x3b   : > { %388 = vrot.lane.b32.xlu1 %v301_v22, %s1350_s22 }
  0x3c   : > { %386 = vrot.lane.b32.xlu0 %v300_v23, %s1350_s22  ;;  %v1553_v23 = vld [vmem:[%s1529_s28 + $0x18] sm:$0xff] }
  0x3f   : > { %544 = vrot.lane.b32.xlu1 %v475_v24, %s1350_s22  ;;  %v1556_v24 = vld [vmem:[%s1529_s28 + $0x10] sm:$0xff] }
  0x40   : > { %542 = vrot.lane.b32.xlu0 %v474_v25, %s1350_s22 }
  0x43   : > { %576 = vrot.lane.b32.xlu1 %v491_v26, %s1350_s22 }
  0x44   : > { %574 = vrot.lane.b32.xlu0 %v490_v27, %s1350_s22 }
  0x47   : > { %548 = vrot.lane.b32.xlu1 %v477_v28, %s1350_s22 }
  0x48   : > { %546 = vrot.lane.b32.xlu0 %v476_v29, %s1350_s22 }
  0x4b   : > { %580 = vrot.lane.b32.xlu1 %v493_v30, %s1350_s22 }
  0x4c   : > { %578 = vrot.lane.b32.xlu0 %v492_v31, %s1350_s22 }
  0x4f   : > { %360 = vrot.lane.b32.xlu1 %v287_v32, %s1350_s22  ;;  %v1562_v32 = vld [vmem:[%s1529_s28 + $0x98] sm:$0xff] }
  0x50   : > { %358 = vrot.lane.b32.xlu0 %v286_v33, %s1350_s22  ;;  %v1565_v33 = vld [vmem:[%s1529_s28 + $0x90] sm:$0xff] }
  0x53   : > { %392 = vrot.lane.b32.xlu1 %v303_v34, %s1350_s22 }
  0x54   : > { %390 = vrot.lane.b32.xlu0 %v302_v35, %s1350_s22 }
  0x57   : > { %364 = vrot.lane.b32.xlu1 %v289_v36, %s1350_s22 }
  0x58   : > { %362 = vrot.lane.b32.xlu0 %v288_v37, %s1350_s22 }
  0x5b   : > { %396 = vrot.lane.b32.xlu1 %v305_v38, %s1350_s22 }
  0x5c   : > { %394 = vrot.lane.b32.xlu0 %v304_v39, %s1350_s22 }
  0x5f   : > { %552 = vrot.lane.b32.xlu1 %v479_v40, %s1350_s22 }
  0x60   : > { %550 = vrot.lane.b32.xlu0 %v478_v41, %s1350_s22 }
  0x63   : > { %584 = vrot.lane.b32.xlu1 %v495_v42, %s1350_s22 }
  0x64   : > { %582 = vrot.lane.b32.xlu0 %v494_v43, %s1350_s22 }
  0x67   : > { %556 = vrot.lane.b32.xlu1 %v481_v44, %s1350_s22 }
  0x68   : > { %554 = vrot.lane.b32.xlu0 %v480_v45, %s1350_s22 }
  0x6b   : > { %588 = vrot.lane.b32.xlu1 %v497_v46, %s1350_s22 }
  0x6c   : > { %586 = vrot.lane.b32.xlu0 %v496_v47, %s1350_s22 }
  0x6f   : > { %368 = vrot.lane.b32.xlu1 %v291_v48, %s1350_s22 }
  0x70   : > { %366 = vrot.lane.b32.xlu0 %v290_v49, %s1350_s22 }
  0x73   : > { %400 = vrot.lane.b32.xlu1 %v307_v50, %s1350_s22 }
  0x74   : > { %398 = vrot.lane.b32.xlu0 %v306_v51, %s1350_s22 }
  0x77   : > { %372 = vrot.lane.b32.xlu1 %v293_v52, %s1350_s22  ;;  %v1573_v52 = vld [vmem:[%s1529_s28 + $0x28] sm:$0xff] }
  0x78   : > { %370 = vrot.lane.b32.xlu0 %v292_v53, %s1350_s22  ;;  %v1576_v53 = vld [vmem:[%s1529_s28 + $0x20] sm:$0xff] }
  0x7b   : > { %404 = vrot.lane.b32.xlu1 %v309_v54, %s1350_s22 }
  0x7c   : > { %402 = vrot.lane.b32.xlu0 %v308_v55, %s1350_s22 }
  0x7f   : > { %560 = vrot.lane.b32.xlu1 %v483_v56, %s1350_s22 }
  0x80   : > { %558 = vrot.lane.b32.xlu0 %v482_v57, %s1350_s22 }
  0x81   : > { %v375_v60 = vpop.permute.xlu1 %374 }
  0x82   : > { %v343_v61 = vpop.permute.xlu0 %342  ;;  %v454_v20 = vadd.f32 %v375_v60, %v1542_v12 }
  0x83   : > { %592 = vrot.lane.b32.xlu1 %v499_v58, %s1350_s22  ;;  %v438_v10 = vadd.f32 %v343_v61, %v1534_v6  ;;  %v1581_v58 = vld [vmem:[%s1529_s28 + $0xa8] sm:$0xff] }
  0x84   : > { %590 = vrot.lane.b32.xlu0 %v498_v59, %s1350_s22  ;;  %v1584_v59 = vld [vmem:[%s1529_s28 + $0xa0] sm:$0xff] }
  0x85   : > { %v377_v0 = vpop.permute.xlu1 %376 }
  0x86   : > { %v345_v1 = vpop.permute.xlu0 %344  ;;  %v455_v21 = vadd.f32 %v377_v0, %v1545_v13 }
  0x87   : > { %564 = vrot.lane.b32.xlu1 %v485_v62, %s1350_s22  ;;  %v439_v11 = vadd.f32 %v345_v1, %v1537_v7 }
  0x88   : > { %562 = vrot.lane.b32.xlu0 %v484_v63, %s1350_s22 }
  0x89   : > { %v349_v4 = vpop.permute.xlu1 %348 }
  0x8a   : > { %v347_v5 = vpop.permute.xlu0 %346  ;;  %v441_v29 = vadd.f32 %v349_v4, %v1553_v23  ;;  %v1592_v4 = vld [vmem:[%s1529_s28 + $0x30] sm:$0xff] }
  0x8b   : > { %596 = vrot.lane.b32.xlu1 %v501_v2, %s1350_s22  ;;  %v440_v30 = vadd.f32 %v347_v5, %v1556_v24 }
  0x8c   : > { %594 = vrot.lane.b32.xlu0 %v500_v3, %s1350_s22  ;;  %v1589_v3 = vld [vmem:[%s1529_s28 + $0x38] sm:$0xff] }
  0x8d   : > { %v381_v8 = vpop.permute.xlu1 %380 }
  0x8e   : > { %v379_v9 = vpop.permute.xlu0 %378  ;;  %v457_v38 = vadd.f32 %v381_v8, %v1562_v32 }
  0x8f   : > { %v456_v39 = vadd.f32 %v379_v9, %v1565_v33 }
  0x91   : > { %v537_v14 = vpop.permute.xlu1 %536 }
  0x92   : > { %v535_v15 = vpop.permute.xlu0 %534  ;;  %v631_v17 = vadd.f32 %v537_v14, %v439_v11 }
  0x93   : > { %v630_v18 = vadd.f32 %v535_v15, %v438_v10 }
  0x95   : > { %v1262_v22 = vpack.i.bf16 %v631_v17, %v630_v18  ;;  %v569_v25 = vpop.permute.xlu1 %568  ;;  %v1601_v17 = vld [vmem:[%s1529_s28 + $0xb0] sm:$0xff] }
  0x96   : > { %v567_v26 = vpop.permute.xlu0 %566  ;;  %v647_v27 = vadd.f32 %v569_v25, %v455_v21 }
  0x97   : > { %v646_v28 = vadd.f32 %v567_v26, %v454_v20  ;;  %1263 = vrot.lane.b32.xlu0 %v1262_v22, %s1351_s5 }
  0x99   : > { %v1267_v31 = vpack.i.bf16 %v647_v27, %v646_v28  ;;  %v541_v34 = vpop.permute.xlu1 %540 }
  0x9a   : > { %v539_v35 = vpop.permute.xlu0 %538  ;;  %v633_v36 = vadd.f32 %v541_v34, %v441_v29 }
  0x9b   : > { %v632_v37 = vadd.f32 %v539_v35, %v440_v30  ;;  %1268 = vrot.lane.b32.xlu1 %v1267_v31, %s1351_s5 }
  0x9d   : > { %v1272_v40 = vpack.i.bf16 %v633_v36, %v632_v37  ;;  %v573_v41 = vpop.permute.xlu1 %572 }
  0x9e   : > { %v571_v42 = vpop.permute.xlu0 %570  ;;  %v649_v43 = vadd.f32 %v573_v41, %v457_v38  ;;  %v1612_v41 = vld [vmem:[%s1529_s28 + $0x40] sm:$0xff] }
  0x9f   : > { %v648_v44 = vadd.f32 %v571_v42, %v456_v39  ;;  %1273 = vrot.lane.b32.xlu0 %v1272_v40, %s1351_s5  ;;  %v1609_v40 = vld [vmem:[%s1529_s28 + $0x48] sm:$0xff] }
  0xa1   : > { %v1277_v45 = vpack.i.bf16 %v649_v43, %v648_v44  ;;  %v353_v46 = vpop.permute.xlu1 %352 }
  0xa2   : > { %v351_v47 = vpop.permute.xlu0 %350  ;;  %v443_v56 = vadd.f32 %v353_v46, %v1573_v52  ;;  %v1617_v46 = vld [vmem:[%s1529_s28 + $0xc8] sm:$0xff] }
  0xa3   : > { %1278 = vrot.lane.b32.xlu1 %v1277_v45, %s1351_s5  ;;  %v442_v57 = vadd.f32 %v351_v47, %v1576_v53  ;;  %v1620_v47 = vld [vmem:[%s1529_s28 + $0xc0] sm:$0xff] }
  0xa5   : > { %v385_v48 = vpop.permute.xlu1 %384 }
  0xa6   : > { %v383_v49 = vpop.permute.xlu0 %382  ;;  %v459_v0 = vadd.f32 %v385_v48, %v1581_v58 }
  0xa7   : > { %v458_v1 = vadd.f32 %v383_v49, %v1584_v59 }
  0xa9   : > { %v357_v50 = vpop.permute.xlu1 %356 }
  0xaa   : > { %v355_v51 = vpop.permute.xlu0 %354  ;;  %v445_v11 = vadd.f32 %v357_v50, %v1589_v3 }
  0xab   : > { %v444_v14 = vadd.f32 %v355_v51, %v1592_v4 }
  0xad   : > { %v389_v54 = vpop.permute.xlu1 %388 }
  0xae   : > { %v387_v55 = vpop.permute.xlu0 %386  ;;  %v461_v22 = vadd.f32 %v389_v54, %v1598_v16 }
  0xaf   : > { %v460_v25 = vadd.f32 %v387_v55, %v1601_v17 }
  0xb1   : > { %v545_v60 = vpop.permute.xlu1 %544 }
  0xb2   : > { %v543_v61 = vpop.permute.xlu0 %542  ;;  %v635_v62 = vadd.f32 %v545_v60, %v443_v56  ;;  %v1628_v60 = vld [vmem:[%s1529_s28 + $0x50] sm:$0xff] }
  0xb3   : > { %v634_v63 = vadd.f32 %v543_v61, %v442_v57  ;;  %v1625_v57 = vld [vmem:[%s1529_s28 + $0x58] sm:$0xff] }
  0xb5   : > { %v1282_v2 = vpack.i.bf16 %v635_v62, %v634_v63  ;;  %v577_v5 = vpop.permute.xlu1 %576 }
  0xb6   : > { %v575_v8 = vpop.permute.xlu0 %574  ;;  %v651_v9 = vadd.f32 %v577_v5, %v459_v0 }
  0xb7   : > { %v650_v10 = vadd.f32 %v575_v8, %v458_v1  ;;  %1283 = vrot.lane.b32.xlu0 %v1282_v2, %s1351_s5  ;;  %v1634_v8 = vld [vmem:[%s1529_s28 + $0xd8] sm:$0xff] }
  0xb9   : > { %v1287_v15 = vpack.i.bf16 %v651_v9, %v650_v10  ;;  %v549_v18 = vpop.permute.xlu1 %548  ;;  %v1637_v9 = vld [vmem:[%s1529_s28 + $0xd0] sm:$0xff] }
  0xba   : > { %v547_v19 = vpop.permute.xlu0 %546  ;;  %v637_v20 = vadd.f32 %v549_v18, %v445_v11 }
  0xbb   : > { %v636_v21 = vadd.f32 %v547_v19, %v444_v14  ;;  %1288 = vrot.lane.b32.xlu1 %v1287_v15, %s1351_s5 }
  0xbd   : > { %v1292_v26 = vpack.i.bf16 %v637_v20, %v636_v21  ;;  %v581_v27 = vpop.permute.xlu1 %580 }
  0xbe   : > { %v579_v28 = vpop.permute.xlu0 %578  ;;  %v653_v29 = vadd.f32 %v581_v27, %v461_v22 }
  0xbf   : > { %v652_v30 = vadd.f32 %v579_v28, %v460_v25  ;;  %1293 = vrot.lane.b32.xlu0 %v1292_v26, %s1351_s5 }
  0xc1   : > { %v1297_v31 = vpack.i.bf16 %v653_v29, %v652_v30  ;;  %v361_v34 = vpop.permute.xlu1 %360 }
  0xc2   : > { %v359_v35 = vpop.permute.xlu0 %358  ;;  %v447_v44 = vadd.f32 %v361_v34, %v1609_v40 }
  0xc3   : > { %1298 = vrot.lane.b32.xlu1 %v1297_v31, %s1351_s5  ;;  %v446_v45 = vadd.f32 %v359_v35, %v1612_v41 }
  0xc5   : > { %v393_v36 = vpop.permute.xlu1 %392 }
  0xc6   : > { %v391_v37 = vpop.permute.xlu0 %390  ;;  %v463_v54 = vadd.f32 %v393_v36, %v1617_v46  ;;  %v1645_v36 = vld [vmem:[%s1529_s28 + $0x68] sm:$0xff] }
  0xc7   : > { %v462_v55 = vadd.f32 %v391_v37, %v1620_v47  ;;  %v1648_v37 = vld [vmem:[%s1529_s28 + $0x60] sm:$0xff] }
  0xc9   : > { %v365_v38 = vpop.permute.xlu1 %364 }
  0xca   : > { %v363_v39 = vpop.permute.xlu0 %362  ;;  %v449_v1 = vadd.f32 %v365_v38, %v1625_v57 }
  0xcb   : > { %v448_v2 = vadd.f32 %v363_v39, %v1628_v60 }
  0xcd   : > { %v397_v42 = vpop.permute.xlu1 %396 }
  0xce   : > { %v395_v43 = vpop.permute.xlu0 %394  ;;  %v465_v18 = vadd.f32 %v397_v42, %v1634_v8 }
  0xcf   : > { %v464_v19 = vadd.f32 %v395_v43, %v1637_v9 }
  0xd1   : > { %v553_v48 = vpop.permute.xlu1 %552 }
  0xd2   : > { %v551_v49 = vpop.permute.xlu0 %550  ;;  %v639_v50 = vadd.f32 %v553_v48, %v447_v44  ;;  %v1653_v44 = vld [vmem:[%s1529_s28 + $0xe8] sm:$0xff] }
  0xd3   : > { %v638_v51 = vadd.f32 %v551_v49, %v446_v45  ;;  %v1656_v45 = vld [vmem:[%s1529_s28 + $0xe0] sm:$0xff] }
  0xd5   : > { %v1302_v56 = vpack.i.bf16 %v639_v50, %v638_v51  ;;  %v585_v61 = vpop.permute.xlu1 %584 }
  0xd6   : > { %v583_v62 = vpop.permute.xlu0 %582  ;;  %v655_v63 = vadd.f32 %v585_v61, %v463_v54  ;;  %v1661_v61 = vld [vmem:[%s1529_s28 + $0x78] sm:$0xff] }
  0xd7   : > { %v654_v0 = vadd.f32 %v583_v62, %v462_v55  ;;  %1303 = vrot.lane.b32.xlu0 %v1302_v56, %s1351_s5  ;;  %v1664_v62 = vld [vmem:[%s1529_s28 + $0x70] sm:$0xff] }
  0xd9   : > { %v1307_v5 = vpack.i.bf16 %v655_v63, %v654_v0  ;;  %v557_v10 = vpop.permute.xlu1 %556 }
  0xda   : > { %v555_v11 = vpop.permute.xlu0 %554  ;;  %v641_v14 = vadd.f32 %v557_v10, %v449_v1 }
  0xdb   : > { %v640_v15 = vadd.f32 %v555_v11, %v448_v2  ;;  %1308 = vrot.lane.b32.xlu1 %v1307_v5, %s1351_s5 }
  0xdd   : > { %v1312_v20 = vpack.i.bf16 %v641_v14, %v640_v15  ;;  %v589_v21 = vpop.permute.xlu1 %588  ;;  %v1670_v14 = vld [vmem:[%s1529_s28 + $0xf8] sm:$0xff]  ;;  %v1673_v15 = vld [vmem:[%s1529_s28 + $0xf0] sm:$0xff] }
  0xde   : > { %v587_v22 = vpop.permute.xlu0 %586  ;;  %v657_v25 = vadd.f32 %v589_v21, %v465_v18 }
  0xdf   : > { %v656_v26 = vadd.f32 %v587_v22, %v464_v19  ;;  %1313 = vrot.lane.b32.xlu0 %v1312_v20, %s1351_s5 }
  0xe1   : > { %v1317_v27 = vpack.i.bf16 %v657_v25, %v656_v26  ;;  %v369_v28 = vpop.permute.xlu1 %368 }
  0xe2   : > { %v367_v29 = vpop.permute.xlu0 %366  ;;  %v451_v42 = vadd.f32 %v369_v28, %v1645_v36 }
  0xe3   : > { %1318 = vrot.lane.b32.xlu1 %v1317_v27, %s1351_s5  ;;  %v450_v43 = vadd.f32 %v367_v29, %v1648_v37 }
  0xe5   : > { %v401_v30 = vpop.permute.xlu1 %400 }
  0xe6   : > { %v399_v31 = vpop.permute.xlu0 %398  ;;  %v467_v54 = vadd.f32 %v401_v30, %v1653_v44 }
  0xe7   : > { %v466_v55 = vadd.f32 %v399_v31, %v1656_v45 }
  0xe9   : > { %v373_v34 = vpop.permute.xlu1 %372 }
  0xea   : > { %v371_v35 = vpop.permute.xlu0 %370  ;;  %v453_v5 = vadd.f32 %v373_v34, %v1661_v61 }
  0xeb   : > { %v452_v10 = vadd.f32 %v371_v35, %v1664_v62 }
  0xed   : > { %v405_v38 = vpop.permute.xlu1 %404 }
  0xee   : > { %v403_v39 = vpop.permute.xlu0 %402  ;;  %v469_v22 = vadd.f32 %v405_v38, %v1670_v14 }
  0xef   : > { %v468_v25 = vadd.f32 %v403_v39, %v1673_v15 }
  0xf1   : > { %v561_v48 = vpop.permute.xlu1 %560 }
  0xf2   : > { %v559_v49 = vpop.permute.xlu0 %558  ;;  %v643_v50 = vadd.f32 %v561_v48, %v451_v42 }
  0xf3   : > { %v642_v51 = vadd.f32 %v559_v49, %v450_v43 }
  0xf5   : > { %v1322_v56 = vpack.i.bf16 %v643_v50, %v642_v51  ;;  %v593_v63 = vpop.permute.xlu1 %592 }
  0xf6   : > { %v591_v0 = vpop.permute.xlu0 %590  ;;  %v659_v1 = vadd.f32 %v593_v63, %v467_v54 }
  0xf7   : > { %v658_v2 = vadd.f32 %v591_v0, %v466_v55  ;;  %1323 = vrot.lane.b32.xlu0 %v1322_v56, %s1351_s5 }
  0xf9   : > { %v1327_v11 = vpack.i.bf16 %v659_v1, %v658_v2  ;;  %v565_v18 = vpop.permute.xlu1 %564 }
  0xfa   : > { %v563_v19 = vpop.permute.xlu0 %562  ;;  %v645_v20 = vadd.f32 %v565_v18, %v453_v5 }
  0xfb   : > { %v644_v21 = vadd.f32 %v563_v19, %v452_v10  ;;  %1328 = vrot.lane.b32.xlu1 %v1327_v11, %s1351_s5 }
  0xfd   : > { %v1332_v26 = vpack.i.bf16 %v645_v20, %v644_v21  ;;  %v597_v27 = vpop.permute.xlu1 %596 }
  0xfe   : > { %v595_v28 = vpop.permute.xlu0 %594  ;;  %v661_v29 = vadd.f32 %v597_v27, %v469_v22 }
  0xff   : > { %v660_v30 = vadd.f32 %v595_v28, %v468_v25  ;;  %1333 = vrot.lane.b32.xlu0 %v1332_v26, %s1351_s5 }
 0x101   : > { %v1337_v31 = vpack.i.bf16 %v661_v29, %v660_v30 }
 0x103   : > { %1338 = vrot.lane.b32.xlu1 %v1337_v31, %s1351_s5 }
 0x109   : > { %v1264_v34 = vpop.permute.xlu0 %1263 }
 0x10a   : > { %v1266_v35 = vunpack.i.h.bf16 %v1264_v34  ;;  %v1265_v42 = vunpack.i.l.bf16 %v1264_v34 }
 0x10c   : > { %v791_v43 = vsel %vm790_vm1, %v1265_v42, %v1534_v6  ;;  %v792_v38 = vsel %vm790_vm1, %v1266_v35, %v1537_v7 }
 0x10d   : > { %v1269_v39 = vpop.permute.xlu1 %1268  ;;  %v823_v48 = vpack.c.bf16 %v792_v38, %v791_v43 }
 0x10e   : > { %v1271_v49 = vunpack.i.h.bf16 %v1269_v39  ;;  %v1270_v50 = vunpack.i.l.bf16 %v1269_v39 }
 0x10f   : > { %1216 = vmatprep.mubr.msk.bf16.mxu0 %vm840_vm2, %v823_v48 }
 0x110   : > { %v807_v51 = vsel %vm790_vm1, %v1270_v50, %v1542_v12  ;;  %v808_v54 = vsel %vm790_vm1, %v1271_v49, %v1545_v13 }
 0x111   : > { %v1274_v55 = vpop.permute.xlu0 %1273  ;;  %v831_v56 = vpack.c.bf16 %v808_v54, %v807_v51 }
 0x112   : > { %v1276_v63 = vunpack.i.h.bf16 %v1274_v55  ;;  %v1275_v6 = vunpack.i.l.bf16 %v1274_v55 }
 0x113   : > { %1232 = vmatprep.mubr.msk.bf16.mxu1 %vm840_vm2, %v831_v56 }
 0x114   : > { %v794_v7 = vsel %vm790_vm1, %v1276_v63, %v1553_v23  ;;  %v793_v0 = vsel %vm790_vm1, %v1275_v6, %v1556_v24 }
 0x115   : > { %v824_v1 = vpack.c.bf16 %v794_v7, %v793_v0  ;;  %v1279_v2 = vpop.permute.xlu1 %1278 }
 0x116   : > { %v1281_v5 = vunpack.i.h.bf16 %v1279_v2  ;;  %v1280_v10 = vunpack.i.l.bf16 %v1279_v2 }
 0x117   : > { %1217 = vmatmul.mubr.msk.bf16.vlgmr.msra.gmra.mxu0 %vm840_vm2, %v824_v1 }
 0x118   : > { %v810_v12 = vsel %vm790_vm1, %v1281_v5, %v1562_v32  ;;  %v809_v13 = vsel %vm790_vm1, %v1280_v10, %v1565_v33 }
 0x119   : > { %v832_v11 = vpack.c.bf16 %v810_v12, %v809_v13 }
 0x11b   : > { %1233 = vmatmul.mubr.msk.bf16.vlgmr.msra.gmra.mxu1 %vm840_vm2, %v832_v11 }
 0x129   : > { %v1284_v18 = vpop.permute.xlu0 %1283 }
 0x12a   : > { %v1286_v23 = vunpack.i.h.bf16 %v1284_v18  ;;  %v1285_v19 = vunpack.i.l.bf16 %v1284_v18 }
 0x12c   : > { %v796_v24 = vsel %vm790_vm1, %v1286_v23, %v1573_v52  ;;  %v795_v20 = vsel %vm790_vm1, %v1285_v19, %v1576_v53 }
 0x12d   : > { %v825_v21 = vpack.c.bf16 %v796_v24, %v795_v20  ;;  %v1289_v22 = vpop.permute.xlu1 %1288 }
 0x12e   : > { %v1291_v25 = vunpack.i.h.bf16 %v1289_v22  ;;  %v1290_v26 = vunpack.i.l.bf16 %v1289_v22 }
 0x12f   : > { %1220 = vmatprep.mubr.msk.bf16.mxu0 %vm840_vm2, %v825_v21 }
 0x130   : > { %v812_v32 = vsel %vm790_vm1, %v1291_v25, %v1581_v58  ;;  %v811_v33 = vsel %vm790_vm1, %v1290_v26, %v1584_v59 }
 0x131   : > { %v833_v27 = vpack.c.bf16 %v812_v32, %v811_v33  ;;  %v1294_v28 = vpop.permute.xlu0 %1293 }
 0x132   : > { %v1296_v29 = vunpack.i.h.bf16 %v1294_v28  ;;  %v1295_v30 = vunpack.i.l.bf16 %v1294_v28 }
 0x133   : > { %1236 = vmatprep.mubr.msk.bf16.mxu1 %vm840_vm2, %v833_v27 }
 0x134   : > { %v798_v52 = vsel %vm790_vm1, %v1296_v29, %v1589_v3  ;;  %v797_v53 = vsel %vm790_vm1, %v1295_v30, %v1592_v4 }
 0x135   : > { %v826_v31 = vpack.c.bf16 %v798_v52, %v797_v53  ;;  %v1299_v34 = vpop.permute.xlu1 %1298 }
 0x136   : > { %v1301_v35 = vunpack.i.h.bf16 %v1299_v34  ;;  %v1300_v42 = vunpack.i.l.bf16 %v1299_v34 }
 0x137   : > { %1221 = vmatmul.mubr.msk.bf16.gmra.mxu0 %vm840_vm2, %v826_v31 }
 0x138   : > { %v814_v58 = vsel %vm790_vm1, %v1301_v35, %v1598_v16  ;;  %v813_v59 = vsel %vm790_vm1, %v1300_v42, %v1601_v17 }
 0x139   : > { %v834_v43 = vpack.c.bf16 %v814_v58, %v813_v59 }
 0x13b   : > { %1237 = vmatmul.mubr.msk.bf16.gmra.mxu1 %vm840_vm2, %v834_v43 }
 0x149   : > { %v1304_v38 = vpop.permute.xlu0 %1303 }
 0x14a   : > { %v1306_v3 = vunpack.i.h.bf16 %v1304_v38  ;;  %v1305_v39 = vunpack.i.l.bf16 %v1304_v38 }
 0x14c   : > { %v800_v4 = vsel %vm790_vm1, %v1306_v3, %v1609_v40  ;;  %v799_v48 = vsel %vm790_vm1, %v1305_v39, %v1612_v41 }
 0x14d   : > { %v827_v49 = vpack.c.bf16 %v800_v4, %v799_v48  ;;  %v1309_v50 = vpop.permute.xlu1 %1308 }
 0x14e   : > { %v1311_v51 = vunpack.i.h.bf16 %v1309_v50  ;;  %v1310_v54 = vunpack.i.l.bf16 %v1309_v50 }
 0x14f   : > { %1224 = vmatprep.mubr.msk.bf16.mxu0 %vm840_vm2, %v827_v49 }
 0x150   : > { %v816_v16 = vsel %vm790_vm1, %v1311_v51, %v1617_v46  ;;  %v815_v17 = vsel %vm790_vm1, %v1310_v54, %v1620_v47 }
 0x151   : > { %v835_v55 = vpack.c.bf16 %v816_v16, %v815_v17  ;;  %v1314_v56 = vpop.permute.xlu0 %1313 }
 0x152   : > { %v1316_v63 = vunpack.i.h.bf16 %v1314_v56  ;;  %v1315_v6 = vunpack.i.l.bf16 %v1314_v56 }
 0x153   : > { %1240 = vmatprep.mubr.msk.bf16.mxu1 %vm840_vm2, %v835_v55 }
 0x154   : > { %v802_v40 = vsel %vm790_vm1, %v1316_v63, %v1625_v57  ;;  %v801_v41 = vsel %vm790_vm1, %v1315_v6, %v1628_v60 }
 0x155   : > { %v828_v7 = vpack.c.bf16 %v802_v40, %v801_v41  ;;  %v1319_v0 = vpop.permute.xlu1 %1318 }
 0x156   : > { %v1321_v1 = vunpack.i.h.bf16 %v1319_v0  ;;  %v1320_v2 = vunpack.i.l.bf16 %v1319_v0 }
 0x157   : > { %1225 = vmatmul.mubr.msk.bf16.gmra.mxu0 %vm840_vm2, %v828_v7 }
 0x158   : > { %v818_v46 = vsel %vm790_vm1, %v1321_v1, %v1634_v8  ;;  %v817_v47 = vsel %vm790_vm1, %v1320_v2, %v1637_v9 }
 0x159   : > { %v836_v5 = vpack.c.bf16 %v818_v46, %v817_v47 }
 0x15b   : > { %1241 = vmatmul.mubr.msk.bf16.gmra.mxu1 %vm840_vm2, %v836_v5 }
 0x169   : > { %v1324_v10 = vpop.permute.xlu0 %1323 }
 0x16a   : > { %v1326_v57 = vunpack.i.h.bf16 %v1324_v10  ;;  %v1325_v12 = vunpack.i.l.bf16 %v1324_v10 }
 0x16c   : > { %v804_v60 = vsel %vm790_vm1, %v1326_v57, %v1645_v36  ;;  %v803_v13 = vsel %vm790_vm1, %v1325_v12, %v1648_v37 }
 0x16d   : > { %v829_v11 = vpack.c.bf16 %v804_v60, %v803_v13  ;;  %v1329_v18 = vpop.permute.xlu1 %1328 }
 0x16e   : > { %v1331_v23 = vunpack.i.h.bf16 %v1329_v18  ;;  %v1330_v19 = vunpack.i.l.bf16 %v1329_v18 }
 0x16f   : > { %1228 = vmatprep.mubr.msk.bf16.mxu0 %vm840_vm2, %v829_v11 }
 0x170   : > { %v820_v8 = vsel %vm790_vm1, %v1331_v23, %v1653_v44  ;;  %v819_v9 = vsel %vm790_vm1, %v1330_v19, %v1656_v45 }
 0x171   : > { %v837_v24 = vpack.c.bf16 %v820_v8, %v819_v9  ;;  %v1334_v20 = vpop.permute.xlu0 %1333 }
 0x172   : > { %v1336_v21 = vunpack.i.h.bf16 %v1334_v20  ;;  %v1335_v36 = vunpack.i.l.bf16 %v1334_v20 }
 0x173   : > { %1244 = vmatprep.mubr.msk.bf16.mxu1 %vm840_vm2, %v837_v24 }
 0x174   : > { %v806_v37 = vsel %vm790_vm1, %v1336_v21, %v1661_v61  ;;  %v805_v22 = vsel %vm790_vm1, %v1335_v36, %v1664_v62 }
 0x175   : > { %v830_v25 = vpack.c.bf16 %v806_v37, %v805_v22  ;;  %v1339_v26 = vpop.permute.xlu1 %1338 }
 0x176   : > { %v1341_v32 = vunpack.i.h.bf16 %v1339_v26  ;;  %v1340_v44 = vunpack.i.l.bf16 %v1339_v26 }
 0x177   : > { %1229 = vmatmul.mubr.msk.bf16.gmra.mxu0 %vm840_vm2, %v830_v25 }
 0x178   : > { %v822_v45 = vsel %vm790_vm1, %v1341_v32, %v1670_v14  ;;  %v821_v33 = vsel %vm790_vm1, %v1340_v44, %v1673_v15 }
 0x179   : > { %v838_v27 = vpack.c.bf16 %v822_v45, %v821_v33 }
 0x17b   : > { %1245 = vmatmul.mubr.msk.bf16.gmra.mxu1 %vm840_vm2, %v838_v27 }
 0x1d7   : > { %v1218_v61 = vpop.f32.mrf.mxu0 }
 0x1d8   : > { %1056 = vst [vmem:[%s1764_s8 + $0x10] sm:$0xff] %v1218_v61 }
 0x1d9   : > { %v927_v62 = vpop.f32.mrf.mxu0 }
 0x1da   : > { %1054 = vst [vmem:[%s1764_s8] sm:$0xff] %v927_v62 }
 0x1db   : > { %v1219_v14 = vpop.f32.mrf.mxu0  ;;  %v1234_v15 = vpop.f32.mrf.mxu1 }
 0x1dc   : > { %1057 = vst [vmem:[%s1764_s8 + $0x18] sm:$0xff] %v1219_v14  ;;  %1072 = vst [vmem:[%s1764_s8 + $0x90] sm:$0xff] %v1234_v15 }
 0x1dd   : > { %v930_v28 = vpop.f32.mrf.mxu0  ;;  %v991_v29 = vpop.f32.mrf.mxu1 }
 0x1de   : > { %1055 = vst [vmem:[%s1764_s8 + $0x8] sm:$0xff] %v930_v28  ;;  %1070 = vst [vmem:[%s1764_s8 + $0x80] sm:$0xff] %v991_v29 }
 0x1df   : > { %v1235_v30 = vpop.f32.mrf.mxu1 }
 0x1e0   : > { %1073 = vst [vmem:[%s1764_s8 + $0x98] sm:$0xff] %v1235_v30 }
 0x1e1   : > { %v994_v52 = vpop.f32.mrf.mxu1 }
 0x1e2   : > { %1071 = vst [vmem:[%s1764_s8 + $0x88] sm:$0xff] %v994_v52 }
 0x1f7   : > { %v1222_v53 = vpop.f32.mrf.mxu0 }
 0x1f8   : > { %1060 = vst [vmem:[%s1764_s8 + $0x30] sm:$0xff] %v1222_v53 }
 0x1f9   : > { %v943_v31 = vpop.f32.mrf.mxu0 }
 0x1fa   : > { %1058 = vst [vmem:[%s1764_s8 + $0x20] sm:$0xff] %v943_v31 }
 0x1fb   : > { %v1223_v34 = vpop.f32.mrf.mxu0  ;;  %v1238_v35 = vpop.f32.mrf.mxu1 }
 0x1fc   : > { %1061 = vst [vmem:[%s1764_s8 + $0x38] sm:$0xff] %v1223_v34  ;;  %1076 = vst [vmem:[%s1764_s8 + $0xb0] sm:$0xff] %v1238_v35 }
 0x1fd   : > { %v946_v42 = vpop.f32.mrf.mxu0  ;;  %v1007_v58 = vpop.f32.mrf.mxu1 }
 0x1fe   : > { %1059 = vst [vmem:[%s1764_s8 + $0x28] sm:$0xff] %v946_v42  ;;  %1074 = vst [vmem:[%s1764_s8 + $0xa0] sm:$0xff] %v1007_v58 }
 0x1ff   : > { %v1239_v59 = vpop.f32.mrf.mxu1 }
 0x200   : > { %1077 = vst [vmem:[%s1764_s8 + $0xb8] sm:$0xff] %v1239_v59 }
 0x201   : > { %v1010_v43 = vpop.f32.mrf.mxu1 }
 0x202   : > { %1075 = vst [vmem:[%s1764_s8 + $0xa8] sm:$0xff] %v1010_v43 }
 0x217   : > { %v1226_v38 = vpop.f32.mrf.mxu0 }
 0x218   : > { %1064 = vst [vmem:[%s1764_s8 + $0x50] sm:$0xff] %v1226_v38 }
 0x219   : > { %v959_v3 = vpop.f32.mrf.mxu0 }
 0x21a   : > { %1062 = vst [vmem:[%s1764_s8 + $0x40] sm:$0xff] %v959_v3 }
 0x21b   : > { %v1227_v39 = vpop.f32.mrf.mxu0  ;;  %v1242_v4 = vpop.f32.mrf.mxu1 }
 0x21c   : > { %1065 = vst [vmem:[%s1764_s8 + $0x58] sm:$0xff] %v1227_v39  ;;  %1080 = vst [vmem:[%s1764_s8 + $0xd0] sm:$0xff] %v1242_v4 }
 0x21d   : > { %v962_v48 = vpop.f32.mrf.mxu0  ;;  %v1023_v49 = vpop.f32.mrf.mxu1 }
 0x21e   : > { %1063 = vst [vmem:[%s1764_s8 + $0x48] sm:$0xff] %v962_v48  ;;  %1078 = vst [vmem:[%s1764_s8 + $0xc0] sm:$0xff] %v1023_v49 }
 0x21f   : > { %v1243_v50 = vpop.f32.mrf.mxu1 }
 0x220   : > { %1081 = vst [vmem:[%s1764_s8 + $0xd8] sm:$0xff] %v1243_v50 }
 0x221   : > { %v1026_v51 = vpop.f32.mrf.mxu1 }
 0x222   : > { %1079 = vst [vmem:[%s1764_s8 + $0xc8] sm:$0xff] %v1026_v51 }
 0x237   : > { %v1230_v54 = vpop.f32.mrf.mxu0 }
 0x238   : > { %1068 = vst [vmem:[%s1764_s8 + $0x70] sm:$0xff] %v1230_v54 }
 0x239   : > { %v975_v16 = vpop.f32.mrf.mxu0 }
 0x23a   : > { %1066 = vst [vmem:[%s1764_s8 + $0x60] sm:$0xff] %v975_v16 }
 0x23b   : > { %v1231_v17 = vpop.f32.mrf.mxu0  ;;  %v1246_v55 = vpop.f32.mrf.mxu1 }
 0x23c   : > { %1069 = vst [vmem:[%s1764_s8 + $0x78] sm:$0xff] %v1231_v17  ;;  %1084 = vst [vmem:[%s1764_s8 + $0xf0] sm:$0xff] %v1246_v55 }
 0x23d   : > { %v978_v56 = vpop.f32.mrf.mxu0  ;;  %v1039_v63 = vpop.f32.mrf.mxu1 }
 0x23e   : > { %1067 = vst [vmem:[%s1764_s8 + $0x68] sm:$0xff] %v978_v56  ;;  %1082 = vst [vmem:[%s1764_s8 + $0xe0] sm:$0xff] %v1039_v63 }
 0x23f   : > { %v1247_v6 = vpop.f32.mrf.mxu1 }
 0x240   : > { %1085 = vst [vmem:[%s1764_s8 + $0xf8] sm:$0xff] %v1247_v6 }
 0x241   : > { %v1042_v40 = vpop.f32.mrf.mxu1 }
 0x242   : > { %1083 = vst [vmem:[%s1764_s8 + $0xe8] sm:$0xff] %v1042_v40 }
 0x243 PF: > { %s14_s15 = sadd.s32 1, %s1348_s15  }
 0x244   : > { %p11_p4 = scmp.ge.s32.totalorder %s14_s15, 4  }
 0x246   :  { %13 = sbr.rel (!%p11_p4) target bundleno = 1 (0x1), region = 72 }

</bundles_post_ra>
